<compile_context>
chip_gen: v7x
topology: tpu7x:2x2x1
jax: 0.10.0
libtpu: 0.0.40
codegen_flags: <defaults>
</compile_context>

<pallas_src>
import jax
import jax.numpy as jnp
from jax import lax
from jax.experimental import pallas as pl
from jax.experimental.pallas import tpu as pltpu


def _make_kernel(n_real, n_pad):
    mask_keys = (n_real != n_pad)

    def kernel(xres_ref, q_ref, kt_ref, v_ref, gamma_ref, out_ref):
        # xres_ref : (1, C,   TQ)   fp32   residual tile of x
        # q_ref    : (1, C8p, TQ)   bf16   query projection tile
        # kt_ref   : (1, Npad, C8p) bf16   key projection (transposed), resident per batch
        # v_ref    : (1, C,  Npad)  bf16   value projection, resident per batch
        # gamma_ref: (1,)           fp32   scalar in SMEM
        # out_ref  : (1, C,   TQ)   fp32
        q = q_ref[0]                                     # (C8p, TQ)
        kt = kt_ref[0]                                   # (Npad, C8p)

        # energy^T : energy_t[j, i] = sum_c k[c, j] * q[c, i]   (plain NN matmul)
        energy = jnp.dot(kt, q, preferred_element_type=jnp.float32)   # (Npad, TQ)
        if mask_keys:
            row = lax.broadcasted_iota(jnp.int32, energy.shape, 0)
            energy = jnp.where(row < n_real, energy, -1e30)

        # softmax over keys (axis 0 here == torch softmax(dim=-1) on energy)
        m = jnp.max(energy, axis=0, keepdims=True)       # (1, TQ)
        e = jnp.exp(energy - m)
        s = jnp.sum(e, axis=0, keepdims=True)            # (1, TQ)
        attn = (e * pl.reciprocal(s, approx=True)).astype(jnp.bfloat16)  # (Npad, TQ)

        # out[c, i] = sum_j v[c, j] * attn[j, i]          (plain NN matmul)
        out = jnp.dot(v_ref[0], attn, preferred_element_type=jnp.float32)  # (C, TQ)

        out_ref[0] = gamma_ref[0] * out + xres_ref[0]

    return kernel


def self_attn_pallas(x, wq, bq, wk, bk, wv, bv, gamma):
    """x: (B, C, H, W) float32 (NCHW, as in PyTorch)."""
    B, C, H, W = x.shape
    N = H * W
    C8 = wq.shape[0]

    # Pad the q/k projection channels to a bf16 sublane multiple (16): zero rows
    # contribute nothing to the energy contraction -> mathematical no-op.
    C8p = max(16, ((C8 + 15) // 16) * 16)
    # Pad N to a lane multiple; padded keys are masked before the softmax.
    n_pad = ((N + 127) // 128) * 128
    # Small N: one tile per batch (per-grid-step overhead dominates otherwise).
    tq = n_pad if n_pad <= 512 else 128
    num_q = n_pad // tq

    x_cn = x.reshape(B, C, N).astype(jnp.float32)        # pure reshape, no transpose
    if n_pad != N:
        x_cn = jnp.pad(x_cn, ((0, 0), (0, 0), (0, n_pad - N)))

    def pad_rows(w, b):
        if C8p == C8:
            return w, b
        return (jnp.pad(w, ((0, C8p - C8), (0, 0))), jnp.pad(b, ((0, C8p - C8),)))

    wq_p, bq_p = pad_rows(wq.astype(jnp.float32), bq.astype(jnp.float32))
    wk_p, bk_p = pad_rows(wk.astype(jnp.float32), bk.astype(jnp.float32))
    wv_f, bv_f = wv.astype(jnp.float32), bv.astype(jnp.float32)

    # Hoisted 1x1-conv projections: fp32 GEMMs in XLA once per forward, then cast
    # to bf16 once for the MXU (no per-tile recompute / per-tile cast in-kernel).
    proj_q = (jnp.einsum('oc,bcn->bon', wq_p, x_cn)
              + bq_p[None, :, None]).astype(jnp.bfloat16)        # (B, C8p, Npad)
    proj_kt = (jnp.einsum('oc,bcn->bno', wk_p, x_cn)
               + bk_p[None, None, :]).astype(jnp.bfloat16)       # (B, Npad, C8p)
    proj_v = (jnp.einsum('oc,bcn->bon', wv_f, x_cn)
              + bv_f[None, :, None]).astype(jnp.bfloat16)        # (B, C, Npad)
    g1 = jnp.reshape(jnp.asarray(gamma, jnp.float32), (1,))

    kernel = _make_kernel(N, n_pad)

    def run(kv_buffer_count):
        kv_kwargs = {}
        if kv_buffer_count is not None and hasattr(pl, "Buffered"):
            # K^T / V block indices only change with the batch index, so the
            # exposed DMA is once per batch; single-buffer them to save VMEM.
            kv_kwargs = dict(pipeline_mode=pl.Buffered(kv_buffer_count))

        bf16_b, f32_b = 2, 4
        kv_bufs = kv_buffer_count if kv_buffer_count is not None else 2
        est = (kv_bufs * (n_pad * C8p + C * n_pad) * bf16_b      # resident K^T, V
               + 2 * (C8p * tq) * bf16_b                         # q tile (x2 buffers)
               + 2 * 2 * (C * tq) * f32_b                        # x-residual + out tiles
               + 3 * (n_pad * tq) * f32_b)                       # energy / exp / attn temps
        vmem_limit = int(max(32 << 20, min(64 << 20, 2 * est)))

        return pl.pallas_call(
            kernel,
            out_shape=jax.ShapeDtypeStruct((B, C, n_pad), jnp.float32),
            grid=(B, num_q),
            in_specs=[
                pl.BlockSpec((1, C, tq), lambda b, qi: (b, 0, qi)),           # x residual tile
                pl.BlockSpec((1, C8p, tq), lambda b, qi: (b, 0, qi)),         # q tile
                pl.BlockSpec((1, n_pad, C8p), lambda b, qi: (b, 0, 0), **kv_kwargs),  # K^T
                pl.BlockSpec((1, C, n_pad), lambda b, qi: (b, 0, 0), **kv_kwargs),    # V
                pl.BlockSpec(memory_space=pltpu.MemorySpace.SMEM),            # gamma
            ],
            out_specs=pl.BlockSpec((1, C, tq), lambda b, qi: (b, 0, qi)),
            compiler_params=pltpu.CompilerParams(
                dimension_semantics=("parallel", "parallel"),
                vmem_limit_bytes=vmem_limit),
        )(x_cn, proj_q, proj_kt, proj_v, g1)

    try:
        out_cn = run(1)
    except Exception:
        # Older jax / unsupported pipeline_mode -> default double buffering.
        out_cn = run(None)

    if n_pad != N:
        out_cn = out_cn[:, :, :N]
    return out_cn.reshape(B, C, H, W)


def self_attn_reference(x, wq, bq, wk, bk, wv, bv, gamma):
    """Pure-JAX fp32 mirror of the PyTorch forward (for correctness checking)."""
    B, C, H, W = x.shape
    N = H * W
    q = jnp.einsum('oc,bchw->bohw', wq, x) + bq[None, :, None, None]
    k = jnp.einsum('oc,bchw->bohw', wk, x) + bk[None, :, None, None]
    v = jnp.einsum('oc,bchw->bohw', wv, x) + bv[None, :, None, None]
    proj_q = q.reshape(B, -1, N).transpose(0, 2, 1)                  # (B, N, C8)
    proj_k = k.reshape(B, -1, N)                                     # (B, C8, N)
    energy = jnp.einsum('bnc,bcm->bnm', proj_q, proj_k)              # (B, N, N)
    attn = jax.nn.softmax(energy, axis=-1)
    proj_v = v.reshape(B, -1, N)                                     # (B, C, N)
    out = jnp.einsum('bcn,bmn->bcm', proj_v, attn)                   # (B, C, N)
    out = out.reshape(B, C, H, W)
    return gamma * out + x


if __name__ == "__main__":
    B, C, H, W = 2, 32, 16, 16      # in_dim = 32  ->  C // 8 = 4 ; N = 256
    C8 = C // 8

    key = jax.random.PRNGKey(0)
    kx, kq, kbq, kk, kbk, kv, kbv = jax.random.split(key, 7)

    x = jax.random.normal(kx, (B, C, H, W), dtype=jnp.float32)
    wq = jax.random.normal(kq, (C8, C), dtype=jnp.float32) * 0.1     # query_conv 1x1 weight
    bq = jax.random.normal(kbq, (C8,), dtype=jnp.float32) * 0.1
    wk = jax.random.normal(kk, (C8, C), dtype=jnp.float32) * 0.1     # key_conv 1x1 weight
    bk = jax.random.normal(kbk, (C8,), dtype=jnp.float32) * 0.1
    wv = jax.random.normal(kv, (C, C), dtype=jnp.float32) * 0.1      # value_conv 1x1 weight
    bv = jax.random.normal(kbv, (C,), dtype=jnp.float32) * 0.1
    # Module inits gamma to 0; use a nonzero deterministic value so the
    # attention path actually contributes to the checked output.
    gamma = jnp.float32(0.5)

    out = self_attn_pallas(x, wq, bq, wk, bk, wv, bv, gamma)
    out = jax.block_until_ready(out)

    ref = self_attn_reference(x, wq, bq, wk, bk, wv, bv, gamma)
    assert out.shape == (B, C, H, W)
    max_err = float(jnp.max(jnp.abs(out - ref)))
    # bf16 MXU operands (fp32 accumulation) -> loosened tolerance vs fp32 reference.
    assert jnp.allclose(out, ref, rtol=5e-2, atol=5e-2), f"mismatch vs reference, max abs err {max_err}"

    print("KERNEL_OK")
</pallas_src>

<mosaic_0001>
module attributes {stable_mosaic.version = 11 : i64} {
  func.func @kernel(%arg0: i32, %arg1: i32, %arg2: memref<1x32x256xf32, #tpu.memory_space<vmem>>, %arg3: memref<1x16x256xbf16, #tpu.memory_space<vmem>>, %arg4: memref<1x256x16xbf16, #tpu.memory_space<vmem>>, %arg5: memref<1x32x256xbf16, #tpu.memory_space<vmem>>, %arg6: memref<1xf32, #tpu.memory_space<smem>>, %arg7: memref<1x32x256xf32, #tpu.memory_space<vmem>>) attributes {dimension_semantics = [#tpu.dimension_semantics<parallel>, #tpu.dimension_semantics<parallel>], iteration_bounds = array<i64: 2, 1>, scalar_prefetch = 0 : i64, scratch_operands = 0 : i64, tpu.core_type = #tpu.core_type<tc>, window_params = [{transform_indices = @transform_0, window_bounds = array<i64: 1, 32, 256>}, {transform_indices = @transform_1, window_bounds = array<i64: 1, 16, 256>}, {pipeline_mode = #tpu.pipeline_mode<synchronous>, transform_indices = @transform_2, window_bounds = array<i64: 1, 256, 16>}, {pipeline_mode = #tpu.pipeline_mode<synchronous>, transform_indices = @transform_3, window_bounds = array<i64: 1, 32, 256>}, {transform_indices = @transform_4, window_bounds = array<i64: 1>}, {transform_indices = @transform_5, window_bounds = array<i64: 1, 32, 256>}]} {
    %c0 = arith.constant 0 : index
    %c0_0 = arith.constant 0 : index
    %c0_1 = arith.constant 0 : index
    %0 = vector.load %arg3[%c0, %c0_0, %c0_1] : memref<1x16x256xbf16, #tpu.memory_space<vmem>>, vector<1x16x256xbf16>
    %1 = vector.shape_cast %0 : vector<1x16x256xbf16> to vector<16x256xbf16>
    %c0_2 = arith.constant 0 : index
    %c0_3 = arith.constant 0 : index
    %c0_4 = arith.constant 0 : index
    %2 = vector.load %arg4[%c0_2, %c0_3, %c0_4] : memref<1x256x16xbf16, #tpu.memory_space<vmem>>, vector<1x256x16xbf16>
    %3 = vector.shape_cast %2 : vector<1x256x16xbf16> to vector<256x16xbf16>
    %cst = arith.constant dense<0.000000e+00> : vector<256x256xf32>
    %4 = tpu.matmul %3, %1, %cst {dimension_numbers = #tpu.dot_dimension_numbers<[1], [0], [0], [1], [0, 0, 1, 1], [], []>} : vector<256x16xbf16>, vector<16x256xbf16>, vector<256x256xf32> -> vector<256x256xf32>
    %cst_5 = arith.constant dense<0xFF800000> : vector<256xf32>
    %5 = vector.multi_reduction <maximumf>, %4, %cst_5 [0] : vector<256x256xf32> to vector<256xf32>
    %6 = vector.shape_cast %5 : vector<256xf32> to vector<1x256xf32>
    %7 = vector.broadcast %6 : vector<1x256xf32> to vector<256x256xf32>
    %8 = arith.subf %4, %7 : vector<256x256xf32>
    %9 = math.exp %8 : vector<256x256xf32>
    %cst_6 = arith.constant dense<0.000000e+00> : vector<256xf32>
    %10 = vector.multi_reduction <add>, %9, %cst_6 [0] : vector<256x256xf32> to vector<256xf32>
    %11 = vector.shape_cast %10 : vector<256xf32> to vector<1x256xf32>
    %12 = tpu.reciprocal %11 {approx = true} : vector<1x256xf32> -> vector<1x256xf32>
    %13 = vector.broadcast %12 : vector<1x256xf32> to vector<256x256xf32>
    %14 = arith.mulf %9, %13 : vector<256x256xf32>
    %15 = arith.truncf %14 : vector<256x256xf32> to vector<256x256xbf16>
    %c0_7 = arith.constant 0 : index
    %c0_8 = arith.constant 0 : index
    %c0_9 = arith.constant 0 : index
    %16 = vector.load %arg5[%c0_7, %c0_8, %c0_9] : memref<1x32x256xbf16, #tpu.memory_space<vmem>>, vector<1x32x256xbf16>
    %17 = vector.shape_cast %16 : vector<1x32x256xbf16> to vector<32x256xbf16>
    %cst_10 = arith.constant dense<0.000000e+00> : vector<32x256xf32>
    %18 = tpu.matmul %17, %15, %cst_10 {dimension_numbers = #tpu.dot_dimension_numbers<[1], [0], [0], [1], [0, 0, 1, 1], [], []>} : vector<32x256xbf16>, vector<256x256xbf16>, vector<32x256xf32> -> vector<32x256xf32>
    %c0_11 = arith.constant 0 : index
    %19 = memref.load %arg6[%c0_11] : memref<1xf32, #tpu.memory_space<smem>>
    %20 = vector.broadcast %19 : f32 to vector<32x256xf32>
    %21 = arith.mulf %20, %18 : vector<32x256xf32>
    %c0_12 = arith.constant 0 : index
    %c0_13 = arith.constant 0 : index
    %c0_14 = arith.constant 0 : index
    %22 = vector.load %arg2[%c0_12, %c0_13, %c0_14] : memref<1x32x256xf32, #tpu.memory_space<vmem>>, vector<1x32x256xf32>
    %23 = vector.shape_cast %22 : vector<1x32x256xf32> to vector<32x256xf32>
    %24 = arith.addf %21, %23 : vector<32x256xf32>
    %c0_15 = arith.constant 0 : index
    %c0_16 = arith.constant 0 : index
    %c0_17 = arith.constant 0 : index
    %25 = vector.load %arg7[%c0_15, %c0_16, %c0_17] : memref<1x32x256xf32, #tpu.memory_space<vmem>>, vector<1x32x256xf32>
    %26 = vector.shape_cast %25 : vector<1x32x256xf32> to vector<32x256xf32>
    %27 = vector.shape_cast %24 : vector<32x256xf32> to vector<1x32x256xf32>
    tpu.vector_store %arg7[%c0_15, %c0_16, %c0_17], %27 {strides = array<i32>} : memref<1x32x256xf32, #tpu.memory_space<vmem>>, vector<1x32x256xf32>,
    return
  }
  func.func @transform_0(%arg0: i32, %arg1: i32) -> (i32, i32, i32) {
    %c0_i32 = arith.constant 0 : i32
    %c0_i32_0 = arith.constant 0 : i32
    return %arg0, %c0_i32, %arg1 : i32, i32, i32
  }
  func.func @transform_1(%arg0: i32, %arg1: i32) -> (i32, i32, i32) {
    %c0_i32 = arith.constant 0 : i32
    %c0_i32_0 = arith.constant 0 : i32
    return %arg0, %c0_i32, %arg1 : i32, i32, i32
  }
  func.func @transform_2(%arg0: i32, %arg1: i32) -> (i32, i32, i32) {
    %c0_i32 = arith.constant 0 : i32
    %c0_i32_0 = arith.constant 0 : i32
    %c0_i32_1 = arith.constant 0 : i32
    return %arg0, %c0_i32, %c0_i32_0 : i32, i32, i32
  }
  func.func @transform_3(%arg0: i32, %arg1: i32) -> (i32, i32, i32) {
    %c0_i32 = arith.constant 0 : i32
    %c0_i32_0 = arith.constant 0 : i32
    %c0_i32_1 = arith.constant 0 : i32
    return %arg0, %c0_i32, %c0_i32_0 : i32, i32, i32
  }
  func.func @transform_4(%arg0: i32, %arg1: i32) -> i32 {
    %c0_i32 = arith.constant 0 : i32
    %c0_i32_0 = arith.constant 0 : i32
    return %c0_i32 : i32
  }
  func.func @transform_5(%arg0: i32, %arg1: i32) -> (i32, i32, i32) {
    %c0_i32 = arith.constant 0 : i32
    %c0_i32_0 = arith.constant 0 : i32
    return %arg0, %c0_i32, %arg1 : i32, i32, i32
  }
}

module attributes {stable_mosaic.version = 11 : i64} {
  func.func @kernel(%arg0: i32, %arg1: i32, %arg2: memref<1x32x256xf32, #tpu.memory_space<vmem>>, %arg3: memref<1x16x256xbf16, #tpu.memory_space<vmem>>, %arg4: memref<1x256x16xbf16, #tpu.memory_space<vmem>>, %arg5: memref<1x32x256xbf16, #tpu.memory_space<vmem>>, %arg6: memref<1xf32, #tpu.memory_space<smem>>, %arg7: memref<1x32x256xf32, #tpu.memory_space<vmem>>) attributes {dimension_semantics = [#tpu.dimension_semantics<parallel>, #tpu.dimension_semantics<parallel>], iteration_bounds = array<i64: 2, 1>, scalar_prefetch = 0 : i64, scratch_operands = 0 : i64, tpu.core_type = #tpu.core_type<tc>, window_params = [{transform_indices = @transform_0, window_bounds = array<i64: 1, 32, 256>}, {transform_indices = @transform_1, window_bounds = array<i64: 1, 16, 256>}, {transform_indices = @transform_2, window_bounds = array<i64: 1, 256, 16>}, {transform_indices = @transform_3, window_bounds = array<i64: 1, 32, 256>}, {transform_indices = @transform_4, window_bounds = array<i64: 1>}, {transform_indices = @transform_5, window_bounds = array<i64: 1, 32, 256>}]} {
    %c0 = arith.constant 0 : index
    %c0_0 = arith.constant 0 : index
    %c0_1 = arith.constant 0 : index
    %0 = vector.load %arg3[%c0, %c0_0, %c0_1] : memref<1x16x256xbf16, #tpu.memory_space<vmem>>, vector<1x16x256xbf16>
    %1 = vector.shape_cast %0 : vector<1x16x256xbf16> to vector<16x256xbf16>
    %c0_2 = arith.constant 0 : index
    %c0_3 = arith.constant 0 : index
    %c0_4 = arith.constant 0 : index
    %2 = vector.load %arg4[%c0_2, %c0_3, %c0_4] : memref<1x256x16xbf16, #tpu.memory_space<vmem>>, vector<1x256x16xbf16>
    %3 = vector.shape_cast %2 : vector<1x256x16xbf16> to vector<256x16xbf16>
    %cst = arith.constant dense<0.000000e+00> : vector<256x256xf32>
    %4 = tpu.matmul %3, %1, %cst {dimension_numbers = #tpu.dot_dimension_numbers<[1], [0], [0], [1], [0, 0, 1, 1], [], []>} : vector<256x16xbf16>, vector<16x256xbf16>, vector<256x256xf32> -> vector<256x256xf32>
    %cst_5 = arith.constant dense<0xFF800000> : vector<256xf32>
    %5 = vector.multi_reduction <maximumf>, %4, %cst_5 [0] : vector<256x256xf32> to vector<256xf32>
    %6 = vector.shape_cast %5 : vector<256xf32> to vector<1x256xf32>
    %7 = vector.broadcast %6 : vector<1x256xf32> to vector<256x256xf32>
    %8 = arith.subf %4, %7 : vector<256x256xf32>
    %9 = math.exp %8 : vector<256x256xf32>
    %cst_6 = arith.constant dense<0.000000e+00> : vector<256xf32>
    %10 = vector.multi_reduction <add>, %9, %cst_6 [0] : vector<256x256xf32> to vector<256xf32>
    %11 = vector.shape_cast %10 : vector<256xf32> to vector<1x256xf32>
    %12 = tpu.reciprocal %11 {approx = true} : vector<1x256xf32> -> vector<1x256xf32>
    %13 = vector.broadcast %12 : vector<1x256xf32> to vector<256x256xf32>
    %14 = arith.mulf %9, %13 : vector<256x256xf32>
    %15 = arith.truncf %14 : vector<256x256xf32> to vector<256x256xbf16>
    %c0_7 = arith.constant 0 : index
    %c0_8 = arith.constant 0 : index
    %c0_9 = arith.constant 0 : index
    %16 = vector.load %arg5[%c0_7, %c0_8, %c0_9] : memref<1x32x256xbf16, #tpu.memory_space<vmem>>, vector<1x32x256xbf16>
    %17 = vector.shape_cast %16 : vector<1x32x256xbf16> to vector<32x256xbf16>
    %cst_10 = arith.constant dense<0.000000e+00> : vector<32x256xf32>
    %18 = tpu.matmul %17, %15, %cst_10 {dimension_numbers = #tpu.dot_dimension_numbers<[1], [0], [0], [1], [0, 0, 1, 1], [], []>} : vector<32x256xbf16>, vector<256x256xbf16>, vector<32x256xf32> -> vector<32x256xf32>
    %c0_11 = arith.constant 0 : index
    %19 = memref.load %arg6[%c0_11] : memref<1xf32, #tpu.memory_space<smem>>
    %20 = vector.broadcast %19 : f32 to vector<32x256xf32>
    %21 = arith.mulf %20, %18 : vector<32x256xf32>
    %c0_12 = arith.constant 0 : index
    %c0_13 = arith.constant 0 : index
    %c0_14 = arith.constant 0 : index
    %22 = vector.load %arg2[%c0_12, %c0_13, %c0_14] : memref<1x32x256xf32, #tpu.memory_space<vmem>>, vector<1x32x256xf32>
    %23 = vector.shape_cast %22 : vector<1x32x256xf32> to vector<32x256xf32>
    %24 = arith.addf %21, %23 : vector<32x256xf32>
    %c0_15 = arith.constant 0 : index
    %c0_16 = arith.constant 0 : index
    %c0_17 = arith.constant 0 : index
    %25 = vector.load %arg7[%c0_15, %c0_16, %c0_17] : memref<1x32x256xf32, #tpu.memory_space<vmem>>, vector<1x32x256xf32>
    %26 = vector.shape_cast %25 : vector<1x32x256xf32> to vector<32x256xf32>
    %27 = vector.shape_cast %24 : vector<32x256xf32> to vector<1x32x256xf32>
    tpu.vector_store %arg7[%c0_15, %c0_16, %c0_17], %27 {strides = array<i32>} : memref<1x32x256xf32, #tpu.memory_space<vmem>>, vector<1x32x256xf32>,
    return
  }
  func.func @transform_0(%arg0: i32, %arg1: i32) -> (i32, i32, i32) {
    %c0_i32 = arith.constant 0 : i32
    %c0_i32_0 = arith.constant 0 : i32
    return %arg0, %c0_i32, %arg1 : i32, i32, i32
  }
  func.func @transform_1(%arg0: i32, %arg1: i32) -> (i32, i32, i32) {
    %c0_i32 = arith.constant 0 : i32
    %c0_i32_0 = arith.constant 0 : i32
    return %arg0, %c0_i32, %arg1 : i32, i32, i32
  }
  func.func @transform_2(%arg0: i32, %arg1: i32) -> (i32, i32, i32) {
    %c0_i32 = arith.constant 0 : i32
    %c0_i32_0 = arith.constant 0 : i32
    %c0_i32_1 = arith.constant 0 : i32
    return %arg0, %c0_i32, %c0_i32_0 : i32, i32, i32
  }
  func.func @transform_3(%arg0: i32, %arg1: i32) -> (i32, i32, i32) {
    %c0_i32 = arith.constant 0 : i32
    %c0_i32_0 = arith.constant 0 : i32
    %c0_i32_1 = arith.constant 0 : i32
    return %arg0, %c0_i32, %c0_i32_0 : i32, i32, i32
  }
  func.func @transform_4(%arg0: i32, %arg1: i32) -> i32 {
    %c0_i32 = arith.constant 0 : i32
    %c0_i32_0 = arith.constant 0 : i32
    return %c0_i32 : i32
  }
  func.func @transform_5(%arg0: i32, %arg1: i32) -> (i32, i32, i32) {
    %c0_i32 = arith.constant 0 : i32
    %c0_i32_0 = arith.constant 0 : i32
    return %arg0, %c0_i32, %arg1 : i32, i32, i32
  }
}

</mosaic_0001>

<bundles_post_ra>
// kernel: tpu_custom_call.1
= control target key start
LH: loop header
LB: loop body
LE: loop exit
PB: predicated region body
PF: predicated region fallthrough
CT: control target
= control target key end

     0   :  { %s2859_s0 = inlined_call_operand.vmem [shape: f32[2,32,256], index: 0, kind: input, shape index: {}]   ;;  %s2860_s1 = inlined_call_operand.vmem [shape: bf16[2,16,256], index: 1, kind: input, shape index: {}]   ;;  %s2861_s2 = inlined_call_operand.vmem [shape: bf16[2,256,16], index: 2, kind: input, shape index: {}]   ;;  %s2862_s3 = inlined_call_operand.vmem [shape: bf16[2,32,256], index: 3, kind: input, shape index: {}]   ;;  %s2863_s4 = inlined_call_operand.<no memory space> [shape: f32[1], index: 4, kind: input, shape index: {}]   ;;  %s2864_s5 = inlined_call_operand.hbm [shape: f32[2,32,256], index: 5, kind: output, shape index: {}]  }
   0x1   :  { %10 = sst [smem:[#allocation2]] %s2863_s4 }
   0x2   :  { %11 = vsyncpa [#allocation4], 0 }
   0x3   :  { %13 = vsyncpa [#allocation4 + $0x1], 0  ;;  %s1784_s20 = smov 0   ;;  %s1786_s21 = smov 0  }
   0x4   :  { %s1788_s22 = smov 0   ;;  %s1790_s23 = smov 0  }
   0x5   :  { %s1792_s24 = smov 0   ;;  %s1794_s25 = smov 0  }
   0x6 LB: > { %s1390_s4 = sadd.s32 4294967295, %s1745_s25   ;;  %s1391_s26 = sadd.s32 4294967294, %s1745_s25   ;;  %s1745_s25 = sphi %s1794_s25, %s19_s25   ;;  %s1741_s24 = sphi %s1792_s24, %s3065_s24   ;;  %s1737_s23 = sphi %s1790_s23, %s3064_s23   ;;  %s1733_s22 = sphi %s1788_s22, %s3063_s22   ;;  %s1729_s21 = sphi %s1786_s21, %s3062_s21   ;;  %s1725_s20 = sphi %s1784_s20, %s3061_s20  }
   0x7   : > { %s31_s27 = sadd.s32 1, %s1741_s24  ;;  %s169_s28 = sadd.s32 1, %s1733_s22 }
   0x8   : > { %p33_p0 = scmp.ge.s32.totalorder %s31_s27, 2  ;;  %p179_p1 = scmp.ne.s32.totalorder %s1733_s22, %s1729_s21 }
   0x9   : > { %p180_p2 = scmp.eq.s32.totalorder %s1390_s4, 1  ;;  %p185_p3 = scmp.ne.s32.totalorder %s1729_s21, %s1725_s20 }
   0xa   : > { %s3067_s27 = smov (%p33_p0, %s31_s27), 0  ;;  %p186_p5 = scmp.eq.s32.totalorder %s1391_s26, 1 }
   0xb   : > { %p1824_p4 = por %p180_p2, %p179_p1  ;;  %s164_s30 = ssub.s32 %s1741_s24, %s3067_s27 }
   0xc   : > { %p1394_p6 = scmp.ge.s32.totalorder %s1745_s25, 1  ;;  %p167_p7 = scmp.eq.s32.totalorder %s164_s30, 0 }
   0xd   : > { %p1831_p8 = por %p186_p5, %p185_p3  ;;  %p249_p9 = scmp.lt.s32.totalorder %s1745_s25, 3 }
   0xe   : > { %s1837_s7 = scalar_select %p167_p7, %s1733_s22, %s169_s28  }
   0xf   : > { %p250_p10 = pnand %p1394_p6, %p249_p9 }
  0x11   : > { %253 = sbr.rel (%p250_p10) target bundleno = 826 (0x33a), region = 40 }
  0x18   : > { %p301_p11 = scmp.lt.s32.totalorder %s1737_s23, 1  ;;  %v1747_v0 = vmov 0   ;;  %vm456_vm0 = vcmask 130048   ;;  %s1213_s26 = sld [smem:[#allocation2]] }
  0x19   : > { %537 = vmatprep.mubr.bf16.mxu0 %v1747_v0  ;;  %s297_s30 = sand.u32 1, %s1729_s21   ;;  %s1748_s19 = smov [#allocation3]  }
  0x1a   : > { %s1841_s8 = scalar_select %p301_p11, %s1737_s23, 1 }
  0x1c   : > { %s1448_s9 = sshll.u32 %s1841_s8, 4  ;;  %s1449_s13 = sshll.u32 %s1841_s8, 7 }
  0x1d   : > { %s318_s12 = scalar_lea.vmem %s2860_s1, %s1448_s9  ;;  %s1851_s16 = scalar_lea.vmem %s2861_s2, %s1449_s13 }
  0x1e   : > { %v1510_v1 = vld [vmem:[%s318_s12 + $0x4] ss:$8 sps:$4 sm:$0xff]   ;;  %v1512_v2 = vld [vmem:[%s318_s12] ss:$8 sps:$4 sm:$0xff]   ;;  %v1515_v5 = vld [vmem:[%s1851_s16 + $0x10] sm:$0xff]   ;;  %s1450_s17 = sshll.u32 %s1841_s8, 5 }
  0x1f   : > { %505 = vmatprep.subr.bf16.mxu0 %v1510_v1  ;;  %v1513_v3 = vld [vmem:[%s1851_s16] sm:$0xff]   ;;  %v1514_v4 = vld [vmem:[%s1851_s16 + $0x8] sm:$0xff]   ;;  %v1516_v6 = vld [vmem:[%s1851_s16 + $0x18] sm:$0xff]   ;;  %s2469_s4 = scalar_lea.vmem %s2862_s3, %s1450_s17  ;;  %s1447_s28 = sshll.u32 %s1841_s8, 6 }
  0x20   : > { %506 = vmatpush1.bf16.msra.mxu0 %v1512_v2  ;;  %v1517_v7 = vld [vmem:[%s1851_s16 + $0x20] sm:$0xff]   ;;  %v1518_v8 = vld [vmem:[%s1851_s16 + $0x28] sm:$0xff]   ;;  %v1519_v9 = vld [vmem:[%s1851_s16 + $0x30] sm:$0xff]   ;;  %s2791_s11 = scalar_lea.vmem %s2859_s0, %s1447_s28  ;;  %s1395_s12 = sshll.u32 %s297_s30, 6 }
  0x21   : > { %v1520_v10 = vld [vmem:[%s1851_s16 + $0x38] sm:$0xff]   ;;  %v1521_v11 = vld [vmem:[%s1851_s16 + $0x40] sm:$0xff]   ;;  %v1522_v12 = vld [vmem:[%s1851_s16 + $0x48] sm:$0xff]   ;;  %s299_s8 = scalar_lea.vmem [#allocation3], %s1395_s12  ;;  %s1451_s13 = sshll.u32 %s1737_s23, 10 }
  0x22   : > { %v1523_v13 = vld [vmem:[%s1851_s16 + $0x50] sm:$0xff]   ;;  %v1524_v14 = vld [vmem:[%s1851_s16 + $0x58] sm:$0xff]   ;;  %v1525_v15 = vld [vmem:[%s1851_s16 + $0x60] sm:$0xff]   ;;  %s1263_s14 = sshll.u32 %s299_s8, 4  ;;  %s2807_s17 = scalar_lea.hbm %s2864_s5, %s1451_s13  ;;  %s2809_s14 = int_to_ptr.vmem [resolvable:$true] %s1263_s14 }
  0x23   : > { %1422 = vmatmul.mubr.msk.bf16.vlgmr.msra.gmra.mrb[0].mxu0 %vm456_vm0, %v1513_v3  ;;  %v1526_v16 = vld [vmem:[%s1851_s16 + $0x68] sm:$0xff]   ;;  %v1527_v17 = vld [vmem:[%s1851_s16 + $0x70] sm:$0xff]   ;;  %v1528_v18 = vld [vmem:[%s1851_s16 + $0x78] sm:$0xff]   ;;  %s2813_s23 = scalar_lea.sflag [#allocation4], %s297_s30  ;;  %s1667_s18 = scalar_lea.vmem %s2809_s14, 1024 }
  0x24   : > { %547 = vmatprep.mubr.bf16.mxu0 %v1747_v0  ;;  %p1668_p12 = scmp.ne.s32.totalorder %s2809_s14, %s1667_s18 }
  0x26   : > { %p1669_p13 = pnand %p1668_p12, %p1824_p4 }
  0x28   : > { %p1670_p0 = pneg %p1669_p13 }
  0x2b   : > { %1423 = vmatmul.mubr.msk.bf16.gmra.mrb[4].mxu0 %vm456_vm0, %v1514_v4 }
  0x2c   : > { %557 = vmatprep.mubr.bf16.mxu0 %v1747_v0 }
  0x33   : > { %1424 = vmatmul.mubr.msk.bf16.gmra.mrb[8].mxu0 %vm456_vm0, %v1515_v5 }
  0x34   : > { %567 = vmatprep.mubr.bf16.mxu0 %v1747_v0 }
  0x3b   : > { %1425 = vmatmul.mubr.msk.bf16.gmra.mrb[12].mxu0 %vm456_vm0, %v1516_v6 }
  0x3c   : > { %577 = vmatprep.mubr.bf16.mxu0 %v1747_v0 }
  0x43   : > { %1426 = vmatmul.mubr.msk.bf16.gmra.mrb[16].mxu0 %vm456_vm0, %v1517_v7 }
  0x44   : > { %587 = vmatprep.mubr.bf16.mxu0 %v1747_v0 }
  0x4b   : > { %1427 = vmatmul.mubr.msk.bf16.gmra.mrb[20].mxu0 %vm456_vm0, %v1518_v8 }
  0x4c   : > { %597 = vmatprep.mubr.bf16.mxu0 %v1747_v0 }
  0x53   : > { %1428 = vmatmul.mubr.msk.bf16.gmra.mrb[24].mxu0 %vm456_vm0, %v1519_v9 }
  0x54   : > { %607 = vmatprep.mubr.bf16.mxu0 %v1747_v0 }
  0x5b   : > { %1429 = vmatmul.mubr.msk.bf16.gmra.mrb[28].mxu0 %vm456_vm0, %v1520_v10 }
  0x5c   : > { %617 = vmatprep.mubr.bf16.mxu0 %v1747_v0 }
  0x63   : > { %1430 = vmatmul.mubr.msk.bf16.gmra.mrb[32].mxu0 %vm456_vm0, %v1521_v11 }
  0x64   : > { %627 = vmatprep.mubr.bf16.mxu0 %v1747_v0 }
  0x6b   : > { %1431 = vmatmul.mubr.msk.bf16.gmra.mrb[36].mxu0 %vm456_vm0, %v1522_v12 }
  0x6c   : > { %637 = vmatprep.mubr.bf16.mxu0 %v1747_v0 }
  0x73   : > { %1432 = vmatmul.mubr.msk.bf16.gmra.mrb[40].mxu0 %vm456_vm0, %v1523_v13 }
  0x74   : > { %647 = vmatprep.mubr.bf16.mxu0 %v1747_v0 }
  0x7b   : > { %1433 = vmatmul.mubr.msk.bf16.gmra.mrb[44].mxu0 %vm456_vm0, %v1524_v14 }
  0x7c   : > { %657 = vmatprep.mubr.bf16.mxu0 %v1747_v0 }
  0x83   : > { %1434 = vmatmul.mubr.msk.bf16.gmra.mrb[48].mxu0 %vm456_vm0, %v1525_v15 }
  0x84   : > { %667 = vmatprep.mubr.bf16.mxu0 %v1747_v0 }
  0x8b   : > { %1435 = vmatmul.mubr.msk.bf16.gmra.mrb[52].mxu0 %vm456_vm0, %v1526_v16 }
  0x8c   : > { %677 = vmatprep.mubr.bf16.mxu0 %v1747_v0 }
  0x93   : > { %1436 = vmatmul.mubr.msk.bf16.gmra.mrb[56].mxu0 %vm456_vm0, %v1527_v17 }
  0x94   : > { %687 = vmatprep.mubr.bf16.mxu0 %v1747_v0 }
  0x9b   : > { %1437 = vmatmul.mubr.msk.bf16.gmra.mrb[60].mxu0 %vm456_vm0, %v1528_v18 }
  0xf6   : > { %v1885_v19 = vpop.f32.mrb[0].mxu0 }
  0xf7   : > { %v1887_v20 = vpop.f32.mrb[1].mxu0 }
  0xf8   : > { %v1889_v21 = vpop.f32.mrb[2].mxu0 }
  0xf9   : > { %v1891_v22 = vpop.f32.mrb[3].mxu0 }
  0xfe   : > { %v1893_v23 = vpop.f32.mrb[4].mxu0 }
  0xff   : > { %v698_v24 = vmax.f32 %v1885_v19, %v1893_v23  ;;  %v1897_v25 = vpop.f32.mrb[5].mxu0 }
 0x100   : > { %v735_v26 = vmax.f32 %v1887_v20, %v1897_v25  ;;  %v1901_v27 = vpop.f32.mrb[6].mxu0 }
 0x101   : > { %v699_v28 = vmax.f32 %v1889_v21, %v1901_v27  ;;  %v1905_v29 = vpop.f32.mrb[7].mxu0 }
 0x102   : > { %v736_v30 = vmax.f32 %v1891_v22, %v1905_v29 }
 0x106   : > { %v1909_v31 = vpop.f32.mrb[8].mxu0 }
 0x107   : > { %v700_v32 = vmax.f32 %v698_v24, %v1909_v31  ;;  %v1912_v33 = vpop.f32.mrb[9].mxu0 }
 0x108   : > { %v737_v34 = vmax.f32 %v735_v26, %v1912_v33  ;;  %v1915_v35 = vpop.f32.mrb[10].mxu0 }
 0x109   : > { %v701_v36 = vmax.f32 %v699_v28, %v1915_v35  ;;  %v1918_v37 = vpop.f32.mrb[11].mxu0 }
 0x10a   : > { %v738_v38 = vmax.f32 %v736_v30, %v1918_v37 }
 0x10e   : > { %v1921_v39 = vpop.f32.mrb[12].mxu0 }
 0x10f   : > { %v702_v40 = vmax.f32 %v700_v32, %v1921_v39  ;;  %v1924_v41 = vpop.f32.mrb[13].mxu0 }
 0x110   : > { %v739_v42 = vmax.f32 %v737_v34, %v1924_v41  ;;  %v1927_v43 = vpop.f32.mrb[14].mxu0 }
 0x111   : > { %v703_v44 = vmax.f32 %v701_v36, %v1927_v43  ;;  %v1930_v45 = vpop.f32.mrb[15].mxu0 }
 0x112   : > { %v740_v46 = vmax.f32 %v738_v38, %v1930_v45 }
 0x116   : > { %v1933_v47 = vpop.f32.mrb[16].mxu0 }
 0x117   : > { %v704_v48 = vmax.f32 %v702_v40, %v1933_v47  ;;  %v1936_v49 = vpop.f32.mrb[17].mxu0 }
 0x118   : > { %v741_v50 = vmax.f32 %v739_v42, %v1936_v49  ;;  %v1939_v51 = vpop.f32.mrb[18].mxu0 }
 0x119   : > { %v705_v52 = vmax.f32 %v703_v44, %v1939_v51  ;;  %v1942_v53 = vpop.f32.mrb[19].mxu0 }
 0x11a   : > { %v742_v54 = vmax.f32 %v740_v46, %v1942_v53 }
 0x11e   : > { %v1945_v55 = vpop.f32.mrb[20].mxu0 }
 0x11f   : > { %v706_v56 = vmax.f32 %v704_v48, %v1945_v55  ;;  %v1948_v57 = vpop.f32.mrb[21].mxu0 }
 0x120   : > { %v743_v58 = vmax.f32 %v741_v50, %v1948_v57  ;;  %v1951_v59 = vpop.f32.mrb[22].mxu0 }
 0x121   : > { %v707_v60 = vmax.f32 %v705_v52, %v1951_v59  ;;  %v1954_v61 = vpop.f32.mrb[23].mxu0 }
 0x122   : > { %2924 = vst [vmem:[#allocation6_spill] sm:$0xff] %v1954_v61  ;;  %v744_v62 = vmax.f32 %v742_v54, %v1954_v61 }
 0x126   : > { %v1957_v63 = vpop.f32.mrb[24].mxu0 }
 0x127   : > { %v708_v0 = vmax.f32 %v706_v56, %v1957_v63  ;;  %v1960_v1 = vpop.f32.mrb[25].mxu0 }
 0x128   : > { %2925 = vst [vmem:[#allocation7_spill] sm:$0xff] %v1960_v1  ;;  %v745_v2 = vmax.f32 %v743_v58, %v1960_v1  ;;  %v1963_v3 = vpop.f32.mrb[26].mxu0 }
 0x129   : > { %v709_v4 = vmax.f32 %v707_v60, %v1963_v3  ;;  %v1966_v5 = vpop.f32.mrb[27].mxu0 }
 0x12a   : > { %2926 = vst [vmem:[#allocation8_spill] sm:$0xff] %v1966_v5  ;;  %v746_v6 = vmax.f32 %v744_v62, %v1966_v5 }
 0x12e   : > { %v1969_v7 = vpop.f32.mrb[28].mxu0 }
 0x12f   : > { %v710_v8 = vmax.f32 %v708_v0, %v1969_v7  ;;  %v1972_v9 = vpop.f32.mrb[29].mxu0 }
 0x130   : > { %2927 = vst [vmem:[#allocation9_spill] sm:$0xff] %v1972_v9  ;;  %v747_v10 = vmax.f32 %v745_v2, %v1972_v9  ;;  %v1975_v11 = vpop.f32.mrb[30].mxu0 }
 0x131   : > { %v711_v12 = vmax.f32 %v709_v4, %v1975_v11  ;;  %v1978_v13 = vpop.f32.mrb[31].mxu0 }
 0x132   : > { %2928 = vst [vmem:[#allocation10_spill] sm:$0xff] %v1978_v13  ;;  %v748_v14 = vmax.f32 %v746_v6, %v1978_v13 }
 0x136   : > { %v1981_v15 = vpop.f32.mrb[32].mxu0 }
 0x137   : > { %v712_v16 = vmax.f32 %v710_v8, %v1981_v15  ;;  %v1984_v17 = vpop.f32.mrb[33].mxu0 }
 0x138   : > { %2929 = vst [vmem:[#allocation11_spill] sm:$0xff] %v1984_v17  ;;  %v749_v18 = vmax.f32 %v747_v10, %v1984_v17  ;;  %v1987_v24 = vpop.f32.mrb[34].mxu0 }
 0x139   : > { %v713_v26 = vmax.f32 %v711_v12, %v1987_v24  ;;  %v1990_v28 = vpop.f32.mrb[35].mxu0 }
 0x13a   : > { %2930 = vst [vmem:[#allocation12_spill] sm:$0xff] %v1990_v28  ;;  %v750_v30 = vmax.f32 %v748_v14, %v1990_v28 }
 0x13e   : > { %v1993_v32 = vpop.f32.mrb[36].mxu0 }
 0x13f   : > { %v714_v34 = vmax.f32 %v712_v16, %v1993_v32  ;;  %v1996_v36 = vpop.f32.mrb[37].mxu0 }
 0x140   : > { %2931 = vst [vmem:[#allocation13_spill] sm:$0xff] %v1996_v36  ;;  %v751_v38 = vmax.f32 %v749_v18, %v1996_v36  ;;  %v1999_v40 = vpop.f32.mrb[38].mxu0 }
 0x141   : > { %v715_v42 = vmax.f32 %v713_v26, %v1999_v40  ;;  %v2002_v44 = vpop.f32.mrb[39].mxu0 }
 0x142   : > { %2932 = vst [vmem:[#allocation14_spill] sm:$0xff] %v2002_v44  ;;  %v752_v46 = vmax.f32 %v750_v30, %v2002_v44 }
 0x146   : > { %v2005_v48 = vpop.f32.mrb[40].mxu0 }
 0x147   : > { %v716_v50 = vmax.f32 %v714_v34, %v2005_v48  ;;  %v2008_v52 = vpop.f32.mrb[41].mxu0 }
 0x148   : > { %2933 = vst [vmem:[#allocation15_spill] sm:$0xff] %v2008_v52  ;;  %v753_v54 = vmax.f32 %v751_v38, %v2008_v52  ;;  %v2011_v56 = vpop.f32.mrb[42].mxu0 }
 0x149   : > { %v717_v58 = vmax.f32 %v715_v42, %v2011_v56  ;;  %v2014_v60 = vpop.f32.mrb[43].mxu0 }
 0x14a   : > { %2934 = vst [vmem:[#allocation16_spill] sm:$0xff] %v2014_v60  ;;  %v754_v62 = vmax.f32 %v752_v46, %v2014_v60 }
 0x14e   : > { %v2017_v0 = vpop.f32.mrb[44].mxu0 }
 0x14f   : > { %v718_v2 = vmax.f32 %v716_v50, %v2017_v0  ;;  %v2020_v4 = vpop.f32.mrb[45].mxu0 }
 0x150   : > { %2935 = vst [vmem:[#allocation17_spill] sm:$0xff] %v2020_v4  ;;  %v755_v6 = vmax.f32 %v753_v54, %v2020_v4  ;;  %v2023_v8 = vpop.f32.mrb[46].mxu0 }
 0x151   : > { %v719_v10 = vmax.f32 %v717_v58, %v2023_v8  ;;  %v2026_v12 = vpop.f32.mrb[47].mxu0 }
 0x152   : > { %2936 = vst [vmem:[#allocation18_spill] sm:$0xff] %v2026_v12  ;;  %v756_v14 = vmax.f32 %v754_v62, %v2026_v12 }
 0x156   : > { %v2029_v16 = vpop.f32.mrb[48].mxu0 }
 0x157   : > { %v720_v18 = vmax.f32 %v718_v2, %v2029_v16  ;;  %v2032_v26 = vpop.f32.mrb[49].mxu0 }
 0x158   : > { %2937 = vst [vmem:[#allocation19_spill] sm:$0xff] %v2032_v26  ;;  %v757_v30 = vmax.f32 %v755_v6, %v2032_v26  ;;  %v2035_v34 = vpop.f32.mrb[50].mxu0 }
 0x159   : > { %v721_v38 = vmax.f32 %v719_v10, %v2035_v34  ;;  %v2038_v42 = vpop.f32.mrb[51].mxu0 }
 0x15a   : > { %2938 = vst [vmem:[#allocation20_spill] sm:$0xff] %v2038_v42  ;;  %v758_v46 = vmax.f32 %v756_v14, %v2038_v42 }
 0x15e   : > { %v2041_v50 = vpop.f32.mrb[52].mxu0 }
 0x15f   : > { %v722_v54 = vmax.f32 %v720_v18, %v2041_v50  ;;  %v2044_v58 = vpop.f32.mrb[53].mxu0 }
 0x160   : > { %2939 = vst [vmem:[#allocation21_spill] sm:$0xff] %v2044_v58  ;;  %v759_v62 = vmax.f32 %v757_v30, %v2044_v58  ;;  %v2047_v2 = vpop.f32.mrb[54].mxu0 }
 0x161   : > { %v723_v6 = vmax.f32 %v721_v38, %v2047_v2  ;;  %v2050_v26 = vpop.f32.mrb[55].mxu0 }
 0x162   : > { %2940 = vst [vmem:[#allocation22_spill] sm:$0xff] %v2050_v26  ;;  %v760_v10 = vmax.f32 %v758_v46, %v2050_v26 }
 0x166   : > { %v2053_v12 = vpop.f32.mrb[56].mxu0 }
 0x167   : > { %v724_v14 = vmax.f32 %v722_v54, %v2053_v12  ;;  %v2056_v42 = vpop.f32.mrb[57].mxu0 }
 0x168   : > { %2941 = vst [vmem:[#allocation23_spill] sm:$0xff] %v2056_v42  ;;  %v761_v18 = vmax.f32 %v759_v62, %v2056_v42  ;;  %v2059_v4 = vpop.f32.mrb[58].mxu0 }
 0x169   : > { %v725_v30 = vmax.f32 %v723_v6, %v2059_v4  ;;  %v2062_v58 = vpop.f32.mrb[59].mxu0 }
 0x16a   : > { %2942 = vst [vmem:[#allocation24_spill] sm:$0xff] %v2062_v58  ;;  %v762_v38 = vmax.f32 %v760_v10, %v2062_v58 }
 0x16e   : > { %v2065_v60 = vpop.f32.mrb[60].mxu0 }
 0x16f   : > { %v726_v46 = vmax.f32 %v724_v14, %v2065_v60  ;;  %v2068_v26 = vpop.f32.mrb[61].mxu0 }
 0x170   : > { %2943 = vst [vmem:[#allocation25_spill] sm:$0xff] %v2068_v26  ;;  %v763_v54 = vmax.f32 %v761_v18, %v2068_v26  ;;  %v2071_v52 = vpop.f32.mrb[62].mxu0 }
 0x171   : > { %v727_v62 = vmax.f32 %v725_v30, %v2071_v52  ;;  %v2074_v42 = vpop.f32.mrb[63].mxu0 }
 0x172   : > { %2944 = vst [vmem:[#allocation26_spill] sm:$0xff] %v2074_v42  ;;  %v764_v6 = vmax.f32 %v762_v38, %v2074_v42 }
 0x173   : > { %v728_v44 = vmax.f32 %v726_v46, %v727_v62 }
 0x174   : > { %v765_v36 = vmax.f32 %v763_v54, %v764_v6 }
 0x175   : > { %v729_v28 = vrot.slane %v728_v44, 4 }
 0x176   : > { %v766_v10 = vrot.slane %v765_v36, 4 }
 0x177   : > { %v730_v58 = vmax.f32 %v728_v44, %v729_v28 }
 0x178   : > { %v767_v17 = vmax.f32 %v765_v36, %v766_v10 }
 0x179   : > { %v731_v13 = vrot.slane %v730_v58, 2 }
 0x17a   : > { %v768_v14 = vrot.slane %v767_v17, 2 }
 0x17b   : > { %v732_v9 = vmax.f32 %v730_v58, %v731_v13 }
 0x17c   : > { %v769_v5 = vmax.f32 %v767_v17, %v768_v14 }
 0x17d   : > { %v733_v1 = vrot.slane %v732_v9, 1 }
 0x17e   : > { %v770_v18 = vrot.slane %v769_v5, 1 }
 0x17f   : > { %v2077_v26 = vmax.f32 %v732_v9, %v733_v1 }
 0x180   : > { %v2079_v61 = vmax.f32 %v769_v5, %v770_v18 }
 0x181   : > { %v772_v30 = vsub.f32 %v1885_v19, %v2077_v26  ;;  %v774_v38 = vsub.f32 %v1889_v21, %v2077_v26  ;;  %v776_v28 = vsub.f32 %v1893_v23, %v2077_v26  ;;  %v778_v36 = vsub.f32 %v1901_v27, %v2077_v26 }
 0x182   : > { %v780_v13 = vsub.f32 %v1909_v31, %v2077_v26  ;;  %v782_v1 = vsub.f32 %v1915_v35, %v2077_v26  ;;  %v784_v5 = vsub.f32 %v1921_v39, %v2077_v26  ;;  %v786_v19 = vsub.f32 %v1927_v43, %v2077_v26  ;;  %v2967_v39 = vld [vmem:[#allocation22_spill] sm:$0xff] }
 0x183   : > { %v788_v21 = vsub.f32 %v1933_v47, %v2077_v26  ;;  %v790_v23 = vsub.f32 %v1939_v51, %v2077_v26  ;;  %v792_v27 = vsub.f32 %v1945_v55, %v2077_v26  ;;  %v794_v31 = vsub.f32 %v1951_v59, %v2077_v26  ;;  %v2960_v55 = vld [vmem:[#allocation17_spill] sm:$0xff]  ;;  %v2963_v47 = vld [vmem:[#allocation19_spill] sm:$0xff] }
 0x184   : > { %v836_v58 = vmul.f32 1.442695, %v772_v30  ;;  %v840_v6 = vmul.f32 1.442695, %v774_v38  ;;  %v844_v44 = vmul.f32 1.442695, %v776_v28  ;;  %v2972_v59 = vsub.f32 %v1969_v7, %v2077_v26 }
 0x185   : > { %v848_v18 = vmul.f32 1.442695, %v778_v36  ;;  %v852_v46 = vmul.f32 1.442695, %v780_v13  ;;  %v856_v17 = vmul.f32 1.442695, %v782_v1  ;;  %v2975_v7 = vsub.f32 %v1987_v24, %v2077_v26 }
 0x186   : > { %1535 = vpow2.f32 %v836_v58  ;;  %v860_v54 = vmul.f32 1.442695, %v784_v5  ;;  %v864_v9 = vmul.f32 1.442695, %v786_v19  ;;  %v868_v13 = vmul.f32 1.442695, %v788_v21 }
 0x187   : > { %1537 = vpow2.f32 %v840_v6  ;;  %v2947_v21 = vld [vmem:[#allocation6_spill] sm:$0xff]  ;;  %v2948_v5 = vld [vmem:[#allocation7_spill] sm:$0xff]  ;;  %v2949_v19 = vld [vmem:[#allocation8_spill] sm:$0xff]  ;;  %v876_v30 = vmul.f32 1.442695, %v792_v27 }
 0x188   : > { %1539 = vpow2.f32 %v844_v44  ;;  %v2951_v58 = vld [vmem:[#allocation9_spill] sm:$0xff]  ;;  %v2954_v1 = vld [vmem:[#allocation12_spill] sm:$0xff]  ;;  %v2958_v38 = vld [vmem:[#allocation15_spill] sm:$0xff]  ;;  %v892_v28 = vmul.f32 1.442695, %v2972_v59 }
 0x189   : > { %1541 = vpow2.f32 %v848_v18  ;;  %v872_v18 = vmul.f32 1.442695, %v790_v23  ;;  %v2953_v23 = vld [vmem:[#allocation11_spill] sm:$0xff]  ;;  %v2955_v36 = vld [vmem:[#allocation13_spill] sm:$0xff]  ;;  %v2959_v6 = vld [vmem:[#allocation16_spill] sm:$0xff] }
 0x18a   : > { %1543 = vpow2.f32 %v852_v46  ;;  %v2952_v46 = vld [vmem:[#allocation10_spill] sm:$0xff]  ;;  %v2964_v27 = vld [vmem:[#allocation20_spill] sm:$0xff]  ;;  %v904_v59 = vmul.f32 1.442695, %v2975_v7 }
 0x18b   : > { %1545 = vpow2.f32 %v856_v17 }
 0x18c   : > { %1547 = vpow2.f32 %v860_v54 }
 0x18d   : > { %1549 = vpow2.f32 %v864_v9  ;;  %v2957_v9 = vld [vmem:[#allocation14_spill] sm:$0xff] }
 0x18e   : > { %1551 = vpow2.f32 %v868_v13 }
 0x18f   : > { %1553 = vpow2.f32 %v872_v18  ;;  %v2968_v18 = vld [vmem:[#allocation23_spill] sm:$0xff] }
 0x190   : > { %v2157_v44 = vpop.eup %1535  ;;  %1555 = vpow2.f32 %v876_v30 }
 0x191   : > { %2945 = vst [vmem:[#allocation27_spill] sm:$0xff] %v2157_v44  ;;  %v2165_v17 = vpop.eup %1537 }
 0x192   : > { %2946 = vst [vmem:[#allocation28_spill] sm:$0xff] %v2165_v17  ;;  %v964_v62 = vadd.f32 %v2165_v17, %v2157_v44  ;;  %v2179_v54 = vpop.eup %1539  ;;  %v2971_v44 = vsub.f32 %v1963_v3, %v2077_v26  ;;  %v2974_v3 = vsub.f32 %v1981_v15, %v2077_v26  ;;  %v2977_v15 = vsub.f32 %v1891_v22, %v2079_v61 }
 0x193   : > { %2950 = vst [vmem:[#allocation6_spill] sm:$0xff] %v2179_v54  ;;  %v2192_v51 = vpop.eup %1541 }
 0x194   : > { %v965_v14 = vadd.f32 %v2179_v54, %v964_v62  ;;  %2956 = vst [vmem:[#allocation7_spill] sm:$0xff] %v2192_v51  ;;  %v880_v62 = vmul.f32 1.442695, %v794_v31  ;;  %v2208_v35 = vpop.eup %1543  ;;  %v2969_v54 = vld [vmem:[#allocation24_spill] sm:$0xff]  ;;  %v2970_v31 = vld [vmem:[#allocation25_spill] sm:$0xff] }
 0x195   : > { %2962 = vst [vmem:[#allocation8_spill] sm:$0xff] %v2208_v35  ;;  %v2224_v13 = vpop.eup %1545  ;;  %v888_v17 = vmul.f32 1.442695, %v2971_v44  ;;  %v900_v44 = vmul.f32 1.442695, %v2974_v3 }
 0x196   : > { %v966_v10 = vadd.f32 %v2192_v51, %v965_v14  ;;  %v2966_v14 = vsub.f32 %v1957_v63, %v2077_v26  ;;  %1557 = vpow2.f32 %v880_v62 }
 0x198   : > { %v884_v51 = vmul.f32 1.442695, %v2966_v14  ;;  %v967_v43 = vadd.f32 %v2208_v35, %v966_v10  ;;  %v2233_v14 = vpop.eup %1547 }
 0x199   : > { %v2239_v35 = vpop.eup %1549 }
 0x19a   : > { %v968_v10 = vadd.f32 %v2224_v13, %v967_v43  ;;  %1559 = vpow2.f32 %v884_v51  ;;  %v2245_v42 = vpop.eup %1551  ;;  %v2973_v43 = vsub.f32 %v1975_v11, %v2077_v26 }
 0x19b   : > { %1561 = vpow2.f32 %v888_v17  ;;  %v2254_v51 = vpop.eup %1553  ;;  %v2976_v17 = vsub.f32 %v1887_v20, %v2079_v61  ;;  %v2979_v20 = vsub.f32 %v1897_v25, %v2079_v61 }
 0x19c   : > { %v969_v30 = vadd.f32 %v2233_v14, %v968_v10  ;;  %v896_v62 = vmul.f32 1.442695, %v2973_v43  ;;  %1563 = vpow2.f32 %v892_v28  ;;  %v2263_v43 = vpop.eup %1555  ;;  %v2978_v28 = vsub.f32 %v1993_v32, %v2077_v26 }
 0x19d   : > { %v838_v11 = vmul.f32 1.442695, %v2976_v17  ;;  %v2982_v32 = vsub.f32 %v1905_v29, %v2079_v61 }
 0x19e   : > { %v970_v63 = vadd.f32 %v2239_v35, %v969_v30  ;;  %1565 = vpow2.f32 %v896_v62  ;;  %v908_v3 = vmul.f32 1.442695, %v2978_v28  ;;  %v2980_v62 = vsub.f32 %v1999_v40, %v2077_v26 }
 0x19f   : > { %1567 = vpow2.f32 %v900_v44  ;;  %v2985_v40 = vsub.f32 %v1912_v33, %v2079_v61 }
 0x1a0   : > { %v971_v10 = vadd.f32 %v2245_v42, %v970_v63  ;;  %v842_v63 = vmul.f32 1.442695, %v2977_v15  ;;  %v2272_v7 = vpop.eup %1557  ;;  %1569 = vpow2.f32 %v904_v59  ;;  %v912_v17 = vmul.f32 1.442695, %v2980_v62 }
 0x1a1   : > { %1571 = vpow2.f32 %v838_v11  ;;  %v2983_v59 = vsub.f32 %v2005_v48, %v2077_v26  ;;  %v854_v11 = vmul.f32 1.442695, %v2985_v40  ;;  %v2987_v48 = vsub.f32 %v1918_v37, %v2079_v61 }
 0x1a2   : > { %v972_v30 = vadd.f32 %v2254_v51, %v971_v10  ;;  %v846_v10 = vmul.f32 1.442695, %v2979_v20  ;;  %1573 = vpow2.f32 %v842_v63  ;;  %v2986_v63 = vsub.f32 %v2011_v56, %v2077_v26 }
 0x1a3   : > { %1575 = vpow2.f32 %v908_v3  ;;  %v916_v25 = vmul.f32 1.442695, %v2983_v59  ;;  %v858_v20 = vmul.f32 1.442695, %v2987_v48  ;;  %v2989_v56 = vsub.f32 %v1924_v41, %v2079_v61 }
 0x1a4   : > { %v973_v24 = vadd.f32 %v2263_v43, %v972_v30  ;;  %v2281_v44 = vpop.eup %1559  ;;  %v850_v30 = vmul.f32 1.442695, %v2982_v32  ;;  %1577 = vpow2.f32 %v846_v10  ;;  %v920_v29 = vmul.f32 1.442695, %v2986_v63 }
 0x1a5   : > { %2981 = vst [vmem:[#allocation9_spill] sm:$0xff] %v2281_v44  ;;  %v2290_v28 = vpop.eup %1561  ;;  %1579 = vpow2.f32 %v912_v17  ;;  %v2988_v10 = vsub.f32 %v2017_v0, %v2077_v26  ;;  %v2990_v37 = vsub.f32 %v2023_v8, %v2077_v26  ;;  %v2992_v41 = vsub.f32 %v2029_v16, %v2077_v26 }
 0x1a6   : > { %v974_v22 = vadd.f32 %v2272_v7, %v973_v24  ;;  %2984 = vst [vmem:[#allocation10_spill] sm:$0xff] %v2290_v28  ;;  %v2299_v24 = vpop.eup %1563  ;;  %1581 = vpow2.f32 %v850_v30 }
 0x1a7   : > { %1583 = vpow2.f32 %v916_v25  ;;  %v924_v33 = vmul.f32 1.442695, %v2988_v10  ;;  %v928_v30 = vmul.f32 1.442695, %v2990_v37  ;;  %v2991_v25 = vsub.f32 %v1930_v45, %v2079_v61 }
 0x1a8   : > { %v975_v15 = vadd.f32 %v2281_v44, %v974_v22  ;;  %v2308_v17 = vpop.eup %1565  ;;  %1585 = vpow2.f32 %v854_v11  ;;  %v862_v22 = vmul.f32 1.442695, %v2989_v56  ;;  %v932_v11 = vmul.f32 1.442695, %v2992_v41 }
 0x1a9   : > { %v2313_v32 = vpop.eup %1567  ;;  %1587 = vpow2.f32 %v920_v29  ;;  %v2993_v29 = vsub.f32 %v1936_v49, %v2079_v61  ;;  %v2994_v45 = vsub.f32 %v2035_v34, %v2077_v26  ;;  %v2998_v41 = vsub.f32 %v2047_v2, %v2077_v26 }
 0x1aa   : > { %v976_v3 = vadd.f32 %v2290_v28, %v975_v15  ;;  %v2319_v0 = vpop.eup %1569  ;;  %1589 = vpow2.f32 %v858_v20  ;;  %v866_v15 = vmul.f32 1.442695, %v2991_v25  ;;  %v2997_v25 = vsub.f32 %v1948_v57, %v2079_v61 }
 0x1ab   : > { %v2324_v40 = vpop.eup %1571  ;;  %1591 = vpow2.f32 %v924_v33  ;;  %v936_v20 = vmul.f32 1.442695, %v2994_v45 }
 0x1ac   : > { %v977_v62 = vadd.f32 %v2299_v24, %v976_v3  ;;  %v2330_v8 = vpop.eup %1573  ;;  %1593 = vpow2.f32 %v862_v22  ;;  %v870_v3 = vmul.f32 1.442695, %v2993_v29  ;;  %v2996_v22 = vsub.f32 %v2041_v50, %v2077_v26 }
 0x1ad   : > { %v2335_v48 = vpop.eup %1575  ;;  %1595 = vpow2.f32 %v928_v30  ;;  %v1001_v16 = vadd.f32 %v2330_v8, %v2324_v40 }
 0x1ae   : > { %v978_v59 = vadd.f32 %v2308_v17, %v977_v62  ;;  %v2343_v33 = vpop.eup %1577  ;;  %1597 = vpow2.f32 %v866_v15  ;;  %v2995_v62 = vsub.f32 %v1942_v53, %v2079_v61  ;;  %v940_v34 = vmul.f32 1.442695, %v2996_v22 }
 0x1af   : > { %v2348_v56 = vpop.eup %1579  ;;  %1599 = vpow2.f32 %v932_v11  ;;  %v1002_v30 = vadd.f32 %v2343_v33, %v1001_v16  ;;  %v878_v15 = vmul.f32 1.442695, %v2997_v25  ;;  %v944_v11 = vmul.f32 1.442695, %v2998_v41 }
 0x1b0   : > { %v979_v63 = vadd.f32 %v2313_v32, %v978_v59  ;;  %v874_v49 = vmul.f32 1.442695, %v2995_v62  ;;  %v2355_v59 = vpop.eup %1581  ;;  %1601 = vpow2.f32 %v870_v3  ;;  %v2999_v3 = vsub.f32 %v2947_v21, %v2079_v61 }
 0x1b1   : > { %v2360_v53 = vpop.eup %1583  ;;  %1603 = vpow2.f32 %v936_v20  ;;  %v3000_v20 = vsub.f32 %v2053_v12, %v2077_v26 }
 0x1b2   : > { %v980_v10 = vadd.f32 %v2319_v0, %v979_v63  ;;  %v1003_v63 = vadd.f32 %v2355_v59, %v1002_v30  ;;  %v2367_v29 = vpop.eup %1585  ;;  %1605 = vpow2.f32 %v874_v49  ;;  %v882_v45 = vmul.f32 1.442695, %v2999_v3 }
 0x1b3   : > { %v2372_v57 = vpop.eup %1587  ;;  %1607 = vpow2.f32 %v940_v34  ;;  %v3001_v49 = vsub.f32 %v2948_v5, %v2079_v61  ;;  %v3002_v34 = vsub.f32 %v2059_v4, %v2077_v26 }
 0x1b4   : > { %v981_v37 = vadd.f32 %v2335_v48, %v980_v10  ;;  %v948_v10 = vmul.f32 1.442695, %v3000_v20  ;;  %v1004_v16 = vadd.f32 %v2367_v29, %v1003_v63  ;;  %v2379_v62 = vpop.eup %1589  ;;  %1609 = vpow2.f32 %v878_v15 }
 0x1b5   : > { %v886_v22 = vmul.f32 1.442695, %v3001_v49  ;;  %v2384_v21 = vpop.eup %1591  ;;  %1611 = vpow2.f32 %v944_v11  ;;  %v3003_v15 = vsub.f32 %v2949_v19, %v2079_v61  ;;  %v3004_v11 = vsub.f32 %v2065_v60, %v2077_v26 }
 0x1b6   : > { %v982_v50 = vadd.f32 %v2348_v56, %v981_v37  ;;  %v952_v37 = vmul.f32 1.442695, %v3002_v34  ;;  %v1005_v30 = vadd.f32 %v2379_v62, %v1004_v16  ;;  %v2391_v25 = vpop.eup %1593  ;;  %1613 = vpow2.f32 %v882_v45 }
 0x1b7   : > { %v890_v41 = vmul.f32 1.442695, %v3003_v15  ;;  %v2396_v5 = vpop.eup %1595  ;;  %1615 = vpow2.f32 %v948_v10  ;;  %v3005_v45 = vsub.f32 %v2951_v58, %v2079_v61  ;;  %v3006_v10 = vsub.f32 %v2071_v52, %v2077_v26 }
 0x1b8   : > { %v983_v2 = vadd.f32 %v2360_v53, %v982_v50  ;;  %v956_v50 = vmul.f32 1.442695, %v3004_v11  ;;  %v1006_v63 = vadd.f32 %v2391_v25, %v1005_v30  ;;  %v2403_v3 = vpop.eup %1597  ;;  %1617 = vpow2.f32 %v886_v22 }
 0x1b9   : > { %v894_v20 = vmul.f32 1.442695, %v3005_v45  ;;  %v2408_v19 = vpop.eup %1599  ;;  %1619 = vpow2.f32 %v952_v37  ;;  %v3007_v22 = vsub.f32 %v2952_v46, %v2079_v61  ;;  %v3008_v26 = vsub.f32 %v2953_v23, %v2079_v61 }
 0x1ba   : > { %v984_v12 = vadd.f32 %v2372_v57, %v983_v2  ;;  %v960_v2 = vmul.f32 1.442695, %v3006_v10  ;;  %v1007_v16 = vadd.f32 %v2403_v3, %v1006_v63  ;;  %v2415_v49 = vpop.eup %1601  ;;  %1621 = vpow2.f32 %v890_v41 }
 0x1bb   : > { %v898_v34 = vmul.f32 1.442695, %v3007_v22  ;;  %v2420_v58 = vpop.eup %1603  ;;  %1623 = vpow2.f32 %v956_v50  ;;  %v902_v30 = vmul.f32 1.442695, %v3008_v26  ;;  %v3009_v50 = vsub.f32 %v2954_v1, %v2079_v61 }
 0x1bc   : > { %v985_v4 = vadd.f32 %v2384_v21, %v984_v12  ;;  %v1008_v12 = vadd.f32 %v2415_v49, %v1007_v16  ;;  %v2424_v52 = vpop.eup %1605  ;;  %1625 = vpow2.f32 %v894_v20  ;;  %v3010_v10 = vsub.f32 %v2955_v36, %v2079_v61 }
 0x1bd   : > { %v2429_v15 = vpop.eup %1607  ;;  %1627 = vpow2.f32 %v960_v2 }
 0x1be   : > { %v986_v60 = vadd.f32 %v2396_v5, %v985_v4  ;;  %v1009_v41 = vadd.f32 %v2424_v52, %v1008_v12  ;;  %v2433_v11 = vpop.eup %1609  ;;  %1629 = vpow2.f32 %v898_v34  ;;  %v906_v4 = vmul.f32 1.442695, %v3009_v50 }
 0x1bf   : > { %v2438_v63 = vpop.eup %1611  ;;  %1631 = vpow2.f32 %v902_v30  ;;  %v910_v2 = vmul.f32 1.442695, %v3010_v10  ;;  %v3012_v34 = vsub.f32 %v2957_v9, %v2079_v61  ;;  %v1531_v10 = vld [vmem:[%s2469_s4 + $0x4] ss:$8 sps:$4 sm:$0xff]  }
 0x1c0   : > { %v987_v37 = vadd.f32 %v2408_v19, %v986_v60  ;;  %v1010_v45 = vadd.f32 %v2433_v11, %v1009_v41  ;;  %v2442_v20 = vpop.eup %1613  ;;  %1633 = vpow2.f32 %v906_v4  ;;  %1192 = vmatprep.mubr.bf16.mxu1 %v1531_v10 }
 0x1c1   : > { %v2447_v60 = vpop.eup %1615  ;;  %1635 = vpow2.f32 %v910_v2 }
 0x1c2   : > { %v988_v46 = vadd.f32 %v2420_v58, %v987_v37  ;;  %v1011_v1 = vadd.f32 %v2442_v20, %v1010_v45  ;;  %v2451_v22 = vpop.eup %1617  ;;  %v914_v37 = vmul.f32 1.442695, %v3012_v34  ;;  %v3015_v45 = vsub.f32 %v2959_v6, %v2079_v61 }
 0x1c3   : > { %3011 = vst [vmem:[#allocation11_spill] sm:$0xff] %v2451_v22  ;;  %v2456_v12 = vpop.eup %1619 }
 0x1c4   : > { %v989_v23 = vadd.f32 %v2429_v15, %v988_v46  ;;  %v1012_v36 = vadd.f32 %v2451_v22, %v1011_v1  ;;  %v2461_v30 = vpop.eup %1621  ;;  %v3014_v46 = vsub.f32 %v2958_v38, %v2079_v61  ;;  %1637 = vpow2.f32 %v914_v37 }
 0x1c5   : > { %3013 = vst [vmem:[#allocation12_spill] sm:$0xff] %v2461_v30  ;;  %v2471_v9 = vpop.eup %1623  ;;  %v922_v38 = vmul.f32 1.442695, %v3015_v45  ;;  %v3017_v45 = vld [vmem:[#allocation18_spill] sm:$0xff] }
 0x1c6   : > { %v990_v16 = vadd.f32 %v2438_v63, %v989_v23  ;;  %v918_v41 = vmul.f32 1.442695, %v3014_v46  ;;  %v1013_v4 = vadd.f32 %v2461_v30, %v1012_v36  ;;  %v2475_v23 = vpop.eup %1625 }
 0x1c7   : > { %v2481_v2 = vpop.eup %1627 }
 0x1c8   : > { %v991_v26 = vadd.f32 %v2447_v60, %v990_v16  ;;  %v1014_v1 = vadd.f32 %v2475_v23, %v1013_v4  ;;  %v2485_v34 = vpop.eup %1629  ;;  %1639 = vpow2.f32 %v918_v41 }
 0x1c9   : > { %v2492_v46 = vpop.eup %1631  ;;  %1641 = vpow2.f32 %v922_v38  ;;  %v3020_v38 = vsub.f32 %v2964_v27, %v2079_v61  ;;  %v3023_v27 = vsub.f32 %v2967_v39, %v2079_v61 }
 0x1ca   : > { %v992_v50 = vadd.f32 %v2456_v12, %v991_v26  ;;  %v3016_v26 = vsub.f32 %v2960_v55, %v2079_v61  ;;  %v1015_v6 = vadd.f32 %v2485_v34, %v1014_v1  ;;  %v2498_v41 = vpop.eup %1633  ;;  %v3019_v55 = vsub.f32 %v2963_v47, %v2079_v61 }
 0x1cc   : > { %v993_v16 = vadd.f32 %v2471_v9, %v992_v50  ;;  %v926_v36 = vmul.f32 1.442695, %v3016_v26  ;;  %v3018_v50 = vsub.f32 %v3017_v45, %v2079_v61  ;;  %v1016_v44 = vadd.f32 %v2492_v46, %v1015_v6  ;;  %v2504_v26 = vpop.eup %1635 }
 0x1cd   : > { %v934_v10 = vmul.f32 1.442695, %v3019_v55  ;;  %v938_v45 = vmul.f32 1.442695, %v3020_v38 }
 0x1ce   : > { %v994_v37 = vadd.f32 %v2481_v2, %v993_v16  ;;  %v930_v28 = vmul.f32 1.442695, %v3018_v50  ;;  %1643 = vpow2.f32 %v926_v36  ;;  %v1017_v1 = vadd.f32 %v2498_v41, %v1016_v44  ;;  %v2510_v30 = vpop.eup %1637  ;;  %v3021_v36 = vld [vmem:[#allocation21_spill] sm:$0xff] }
 0x1cf   : > { %v3022_v47 = vsub.f32 %v3021_v36, %v2079_v61 }
 0x1d0   : > { %v995_v4 = vrot.slane %v994_v37, 4  ;;  %1645 = vpow2.f32 %v930_v28  ;;  %v1018_v6 = vadd.f32 %v2504_v26, %v1017_v1  ;;  %v946_v28 = vmul.f32 1.442695, %v3023_v27 }
 0x1d1   : > { %1647 = vpow2.f32 %v934_v10  ;;  %v942_v55 = vmul.f32 1.442695, %v3022_v47  ;;  %v3024_v10 = vsub.f32 %v2968_v18, %v2079_v61 }
 0x1d2   : > { %v996_v16 = vadd.f32 %v995_v4, %v994_v37  ;;  %v1019_v44 = vadd.f32 %v2510_v30, %v1018_v6  ;;  %v2516_v4 = vpop.eup %1639  ;;  %1649 = vpow2.f32 %v938_v45 }
 0x1d3   : > { %v2522_v22 = vpop.eup %1641  ;;  %1651 = vpow2.f32 %v942_v55  ;;  %v950_v36 = vmul.f32 1.442695, %v3024_v10  ;;  %v3026_v55 = vsub.f32 %v2970_v31, %v2079_v61 }
 0x1d4   : > { %v997_v50 = vrot.slane %v996_v16, 2  ;;  %v1020_v1 = vadd.f32 %v2516_v4, %v1019_v44  ;;  %1653 = vpow2.f32 %v946_v28 }
 0x1d5   : > { %1655 = vpow2.f32 %v950_v36  ;;  %v958_v18 = vmul.f32 1.442695, %v3026_v55 }
 0x1d6   : > { %v998_v37 = vadd.f32 %v997_v50, %v996_v16  ;;  %v3025_v16 = vsub.f32 %v2969_v54, %v2079_v61  ;;  %v1021_v45 = vadd.f32 %v2522_v22, %v1020_v1  ;;  %v3027_v1 = vld [vmem:[#allocation26_spill] sm:$0xff] }
 0x1d7   : > { %v3028_v10 = vsub.f32 %v3027_v1, %v2079_v61 }
 0x1d8   : > { %v999_v38 = vrot.slane %v998_v37, 1  ;;  %v954_v50 = vmul.f32 1.442695, %v3025_v16  ;;  %v2531_v6 = vpop.eup %1643 }
 0x1d9   : > { %v1022_v47 = vadd.f32 %v2531_v6, %v1021_v45 }
 0x1da   : > { %v1000_v39 = vadd.f32 %v999_v38, %v998_v37  ;;  %v2534_v44 = vpop.eup %1645  ;;  %1657 = vpow2.f32 %v954_v50  ;;  %v962_v37 = vmul.f32 1.442695, %v3028_v10 }
 0x1db   : > { %v1023_v27 = vadd.f32 %v2534_v44, %v1022_v47  ;;  %v2540_v54 = vpop.eup %1647 }
 0x1dc   : > { %1659 = vrcp.f32 %v1000_v39  ;;  %v2546_v38 = vpop.eup %1649 }
 0x1dd   : > { %v1024_v28 = vadd.f32 %v2540_v54, %v1023_v27  ;;  %1661 = vpow2.f32 %v958_v18  ;;  %v2549_v16 = vpop.eup %1651 }
 0x1de   : > { %1663 = vpow2.f32 %v962_v37  ;;  %v2552_v50 = vpop.eup %1653 }
 0x1df   : > { %v1025_v36 = vadd.f32 %v2546_v38, %v1024_v28  ;;  %v2555_v39 = vpop.eup %1655 }
 0x1e1   : > { %v1026_v31 = vadd.f32 %v2549_v16, %v1025_v36 }
 0x1e3   : > { %v1027_v45 = vadd.f32 %v2552_v50, %v1026_v31 }
 0x1e4   : > { %v2557_v61 = vpop.eup %1657 }
 0x1e5   : > { %v1028_v47 = vadd.f32 %v2555_v39, %v1027_v45 }
 0x1e6   : > { %v2560_v55 = vpop.eup %1659 }
 0x1e7   : > { %v1029_v18 = vadd.f32 %v2557_v61, %v1028_v47  ;;  %v2563_v27 = vpop.eup %1661  ;;  %v2568_v10 = vmul.f32 %v2560_v55, %v2299_v24  ;;  %v2572_v37 = vmul.f32 %v2560_v55, %v2308_v17  ;;  %v2578_v36 = vmul.f32 %v2560_v55, %v2313_v32 }
 0x1e8   : > { %v2574_v28 = vpop.eup %1663  ;;  %v2582_v31 = vmul.f32 %v2560_v55, %v2319_v0  ;;  %v2589_v47 = vmul.f32 %v2560_v55, %v2335_v48  ;;  %v2593_v17 = vmul.f32 %v2560_v55, %v2348_v56  ;;  %v2599_v0 = vmul.f32 %v2560_v55, %v2360_v53 }
 0x1e9   : > { %v1030_v1 = vadd.f32 %v2563_v27, %v1029_v18  ;;  %v2603_v18 = vmul.f32 %v2560_v55, %v2372_v57  ;;  %v2613_v24 = vmul.f32 %v2560_v55, %v2396_v5  ;;  %v2617_v53 = vmul.f32 %v2560_v55, %v2408_v19 }
 0x1ea   : > { %3029 = vst [vmem:[#allocation13_spill] sm:$0xff] %v2589_v47  ;;  %v2623_v32 = vmul.f32 %v2560_v55, %v2420_v58  ;;  %v2631_v56 = vmul.f32 %v2560_v55, %v2438_v63  ;;  %v2637_v47 = vmul.f32 %v2560_v55, %v2447_v60  ;;  %v2641_v58 = vmul.f32 %v2560_v55, %v2456_v12 }
 0x1eb   : > { %v1031_v45 = vadd.f32 %v2574_v28, %v1030_v1  ;;  %v2607_v1 = vmul.f32 %v2560_v55, %v2384_v21  ;;  %3031 = vst [vmem:[#allocation15_spill] sm:$0xff] %v2613_v24  ;;  %3032 = vst [vmem:[#allocation16_spill] sm:$0xff] %v2617_v53  ;;  %v2627_v21 = vmul.f32 %v2560_v55, %v2429_v15  ;;  %v3039_v24 = vld [vmem:[#allocation7_spill] sm:$0xff] }
 0x1ec   : > { %3033 = vst [vmem:[#allocation17_spill] sm:$0xff] %v2623_v32  ;;  %3035 = vst [vmem:[#allocation20_spill] sm:$0xff] %v2631_v56  ;;  %v2649_v63 = vmul.f32 %v2560_v55, %v2471_v9  ;;  %v3037_v56 = vld [vmem:[#allocation28_spill] sm:$0xff]  ;;  %v3038_v32 = vld [vmem:[#allocation6_spill] sm:$0xff] }
 0x1ed   : > { %3030 = vst [vmem:[#allocation14_spill] sm:$0xff] %v2607_v1  ;;  %v1032_v48 = vrot.slane %v1031_v45, 4  ;;  %3034 = vst [vmem:[#allocation19_spill] sm:$0xff] %v2627_v21  ;;  %v3036_v21 = vld [vmem:[#allocation27_spill] sm:$0xff]  ;;  %v1044_v1 = vmul.f32 %v2560_v55, %v3038_v32 }
 0x1ee   : > { %v1040_v9 = vmul.f32 %v2560_v55, %v3036_v21 }
 0x1ef   : > { %v1033_v5 = vadd.f32 %v1032_v48, %v1031_v45  ;;  %v2653_v45 = vmul.f32 %v2560_v55, %v2481_v2  ;;  %v1042_v2 = vmul.f32 %v2560_v55, %v3037_v56  ;;  %v1046_v48 = vmul.f32 %v2560_v55, %v3039_v24 }
 0x1f1   : > { %v1034_v60 = vrot.slane %v1033_v5, 2  ;;  %v1104_v24 = vpack.c.bf16 %v1042_v2, %v1040_v9 }
 0x1f3   : > { %v1035_v19 = vadd.f32 %v1034_v60, %v1033_v5  ;;  %v3040_v60 = vld [vmem:[#allocation8_spill] sm:$0xff] }
 0x1f5   : > { %v1036_v15 = vrot.slane %v1035_v19, 1 }
 0x1f7   : > { %v1037_v53 = vadd.f32 %v1036_v15, %v1035_v19 }
 0x1f9   : > { %1665 = vrcp.f32 %v1037_v53 }
 0x203   : > { %v2659_v57 = vpop.eup %1665 }
 0x204   : > { %v1041_v5 = vmul.f32 %v2659_v57, %v2324_v40  ;;  %v1043_v53 = vmul.f32 %v2659_v57, %v2330_v8  ;;  %v1045_v19 = vmul.f32 %v2659_v57, %v2343_v33  ;;  %v1047_v21 = vmul.f32 %v2659_v57, %v2355_v59 }
 0x205   : > { %v1049_v56 = vmul.f32 %v2659_v57, %v2367_v29  ;;  %v1051_v32 = vmul.f32 %v2659_v57, %v2379_v62  ;;  %v1048_v40 = vmul.f32 %v2560_v55, %v3040_v60  ;;  %v1050_v8 = vmul.f32 %v2560_v55, %v2224_v13 }
 0x206   : > { %v1105_v15 = vpack.c.bf16 %v1043_v53, %v1041_v5  ;;  %v1052_v33 = vmul.f32 %v2560_v55, %v2233_v14  ;;  %v1107_v12 = vpack.c.bf16 %v1047_v21, %v1045_v19  ;;  %v1106_v59 = vpack.c.bf16 %v1046_v48, %v1044_v1 }
 0x207   : > { %v1053_v5 = vmul.f32 %v2659_v57, %v2391_v25  ;;  %v2691_v29 = vmul.f32 %v2659_v57, %v2475_v23  ;;  %v1055_v62 = vmul.f32 %v2659_v57, %v2403_v3  ;;  %v1071_v13 = vmul.f32 %v2659_v57, %v2485_v34 }
 0x208   : > { %1160 = vmatprep.subr.bf16.mxu1 %v1105_v15  ;;  %v1073_v14 = vmul.f32 %v2659_v57, %v2492_v46  ;;  %v1075_v1 = vmul.f32 %v2659_v57, %v2498_v41  ;;  %v1109_v48 = vpack.c.bf16 %v1051_v32, %v1049_v56  ;;  %v1077_v25 = vmul.f32 %v2659_v57, %v2504_v26 }
 0x209   : > { %1161 = vmatpush1.bf16.msra.mxu1 %v1104_v24  ;;  %v1079_v23 = vmul.f32 %v2659_v57, %v2510_v30  ;;  %v1081_v3 = vmul.f32 %v2659_v57, %v2516_v4  ;;  %v1119_v9 = vpack.c.bf16 %v1071_v13, %v2691_v29  ;;  %v1083_v46 = vmul.f32 %v2659_v57, %v2522_v22  ;;  %v3044_v13 = vld [vmem:[#allocation10_spill] sm:$0xff] }
 0x20a   : > { %1162 = vmatprep.subr.bf16.mxu1 %v1107_v12  ;;  %v1121_v34 = vpack.c.bf16 %v1075_v1, %v1073_v14  ;;  %v1085_v41 = vmul.f32 %v2659_v57, %v2531_v6  ;;  %v1087_v2 = vmul.f32 %v2659_v57, %v2534_v44  ;;  %v1089_v26 = vmul.f32 %v2659_v57, %v2540_v54 }
 0x20b   : > { %v1123_v12 = vpack.c.bf16 %v1079_v23, %v1077_v25  ;;  %v1091_v30 = vmul.f32 %v2659_v57, %v2546_v38  ;;  %v1125_v4 = vpack.c.bf16 %v1083_v46, %v1081_v3  ;;  %v1093_v53 = vmul.f32 %v2659_v57, %v2549_v16 }
 0x20c   : > { %v1095_v22 = vmul.f32 %v2659_v57, %v2552_v50  ;;  %v1097_v6 = vmul.f32 %v2659_v57, %v2555_v39  ;;  %v1127_v19 = vpack.c.bf16 %v1087_v2, %v1085_v41  ;;  %v1099_v54 = vmul.f32 %v2659_v57, %v2557_v61  ;;  %v1532_v41 = vld [vmem:[%s2469_s4 + $0x14] ss:$8 sps:$4 sm:$0xff]  }
 0x20d   : > { %1163 = vmatpush1.bf16.msra.mxu1 %v1106_v59  ;;  %v1129_v44 = vpack.c.bf16 %v1091_v30, %v1089_v26  ;;  %v1101_v38 = vmul.f32 %v2659_v57, %v2563_v27  ;;  %v1108_v21 = vpack.c.bf16 %v1050_v8, %v1048_v40  ;;  %v1054_v15 = vmul.f32 %v2560_v55, %v2239_v35  ;;  %v3041_v59 = vld [vmem:[#allocation11_spill] sm:$0xff] }
 0x20e   : > { %1164 = vmatprep.subr.bf16.mxu1 %v1109_v48  ;;  %v1131_v16 = vpack.c.bf16 %v1095_v22, %v1093_v53  ;;  %v1103_v50 = vmul.f32 %v2659_v57, %v2574_v28  ;;  %v1111_v56 = vpack.c.bf16 %v1055_v62, %v1053_v5  ;;  %v1057_v39 = vmul.f32 %v2659_v57, %v2415_v49  ;;  %v3042_v5 = vld [vmem:[#allocation12_spill] sm:$0xff]  ;;  %v1224_v26 = vld [vmem:[%s2791_s11 + $0x8] sm:$0xff] }
 0x20f   : > { %v1059_v32 = vmul.f32 %v2659_v57, %v2424_v52  ;;  %v1133_v24 = vpack.c.bf16 %v1099_v54, %v1097_v6  ;;  %v1110_v27 = vpack.c.bf16 %v1054_v15, %v1052_v33  ;;  %v1056_v60 = vmul.f32 %v2560_v55, %v2245_v42  ;;  %v1225_v53 = vld [vmem:[%s2791_s11 + $0x10] sm:$0xff] }
 0x210   : > { %v1135_v61 = vpack.c.bf16 %v1103_v50, %v1101_v38  ;;  %v1058_v35 = vmul.f32 %v2560_v55, %v2254_v51  ;;  %v1061_v28 = vmul.f32 %v2659_v57, %v2433_v11  ;;  %v1063_v49 = vmul.f32 %v2659_v57, %v2442_v20  ;;  %v3043_v20 = vld [vmem:[#allocation9_spill] sm:$0xff]  ;;  %v1227_v50 = vld [vmem:[%s2791_s11 + $0x20] sm:$0xff] }
 0x211   : > { %1165 = vmatpush1.bf16.msra.mxu1 %v1108_v21  ;;  %v1113_v40 = vpack.c.bf16 %v1059_v32, %v1057_v39  ;;  %v1060_v8 = vmul.f32 %v2560_v55, %v2263_v43  ;;  %v1062_v33 = vmul.f32 %v2560_v55, %v2272_v7  ;;  %v1065_v51 = vmul.f32 %v2659_v57, %v3041_v59  ;;  %v1228_v32 = vld [vmem:[%s2791_s11 + $0x28] sm:$0xff] }
 0x212   : > { %1166 = vmatprep.subr.bf16.mxu1 %v1111_v56  ;;  %v1112_v52 = vpack.c.bf16 %v1058_v35, %v1056_v60  ;;  %v1115_v42 = vpack.c.bf16 %v1063_v49, %v1061_v28  ;;  %v1067_v29 = vmul.f32 %v2659_v57, %v3042_v5  ;;  %v1064_v62 = vmul.f32 %v2560_v55, %v3043_v20  ;;  %v1230_v28 = vld [vmem:[%s2791_s11 + $0x38] sm:$0xff] }
 0x213   : > { %v1114_v11 = vpack.c.bf16 %v1062_v33, %v1060_v8  ;;  %v1066_v14 = vmul.f32 %v2560_v55, %v3044_v13  ;;  %v3045_v1 = vpack.c.bf16 %v2572_v37, %v2568_v10  ;;  %v3046_v57 = vpack.c.bf16 %v2582_v31, %v2578_v36  ;;  %v3047_v55 = vld [vmem:[#allocation13_spill] sm:$0xff]  ;;  %v3050_v10 = vld [vmem:[#allocation15_spill] sm:$0xff]  ;;  %v3051_v37 = vld [vmem:[#allocation14_spill] sm:$0xff] }
 0x214   : > { %v1117_v43 = vpack.c.bf16 %v1067_v29, %v1065_v51  ;;  %v3048_v48 = vpack.c.bf16 %v2593_v17, %v3047_v55  ;;  %v3049_v25 = vpack.c.bf16 %v2603_v18, %v2599_v0  ;;  %v3052_v23 = vpack.c.bf16 %v3050_v10, %v3051_v37  ;;  %v3053_v36 = vld [vmem:[#allocation17_spill] sm:$0xff]  ;;  %v3054_v31 = vld [vmem:[#allocation16_spill] sm:$0xff]  ;;  %v1529_v18 = vld [vmem:[%s2469_s4] ss:$8 sps:$4 sm:$0xff]  }
 0x215   : > { %1167 = vmatpush1.bf16.msra.mxu1 %v1110_v27  ;;  %v1116_v7 = vpack.c.bf16 %v1066_v14, %v1064_v62  ;;  %v3055_v3 = vpack.c.bf16 %v3053_v36, %v3054_v31  ;;  %v3056_v17 = vld [vmem:[#allocation20_spill] sm:$0xff]  ;;  %v3059_v0 = vpack.c.bf16 %v2641_v58, %v2637_v47  ;;  %v3060_v46 = vpack.c.bf16 %v2653_v45, %v2649_v63  ;;  %v1223_v63 = vld [vmem:[%s2791_s11] sm:$0xff] }
 0x216   : > { %1168 = vmatprep.subr.bf16.mxu1 %v1113_v40  ;;  %v1214_v47 = vstv %s1213_s26  ;;  %v1229_v27 = vld [vmem:[%s2791_s11 + $0x30] sm:$0xff] }
 0x219   : > { %1169 = vmatpush1.bf16.msra.mxu1 %v1112_v52 }
 0x21a   : > { %1170 = vmatprep.subr.bf16.mxu1 %v1115_v42 }
 0x21d   : > { %1171 = vmatpush1.bf16.msra.mxu1 %v1114_v11 }
 0x21e   : > { %1172 = vmatprep.subr.bf16.mxu1 %v1117_v43 }
 0x221   : > { %1173 = vmatpush1.bf16.msra.mxu1 %v1116_v7 }
 0x222   : > { %1174 = vmatprep.subr.bf16.mxu1 %v1119_v9  ;;  %v3057_v9 = vld [vmem:[#allocation19_spill] sm:$0xff] }
 0x225   : > { %1175 = vmatpush1.bf16.msra.mxu1 %v3045_v1 }
 0x226   : > { %1176 = vmatprep.subr.bf16.mxu1 %v1121_v34  ;;  %v3058_v34 = vpack.c.bf16 %v3056_v17, %v3057_v9 }
 0x229   : > { %1177 = vmatpush1.bf16.msra.mxu1 %v3046_v57 }
 0x22a   : > { %1178 = vmatprep.subr.bf16.mxu1 %v1123_v12  ;;  %v1534_v12 = vld [vmem:[%s2469_s4 + $0x10] ss:$8 sps:$4 sm:$0xff]   ;;  %s1671_s4 = sshll.u32 %s1748_s19, 4  ;;  %s1672_s4 = int_to_ptr.vmem [resolvable:$false] %s1671_s4 }
 0x22b   : > { %s1673_s26 = scalar_lea.vmem %s1672_s4, 2048  ;;  %p1674_p1 = scmp.lt.s32.totalorder %s2809_s14, %s1672_s4 }
 0x22c   : > { %p1675_p2 = scmp.lt.s32.totalorder %s1673_s26, %s1667_s18 }
 0x22d   : > { %1179 = vmatpush1.bf16.msra.mxu1 %v3048_v48 }
 0x22e   : > { %1180 = vmatprep.subr.bf16.mxu1 %v1125_v4  ;;  %p1676_p3 = por %p1675_p2, %p1674_p1 }
 0x230   : > { %p1677_p5 = pnand %p1676_p3, %p1670_p0 }
 0x231   : > { %1181 = vmatpush1.bf16.msra.mxu1 %v3049_v25 }
 0x232   : > { %1182 = vmatprep.subr.bf16.mxu1 %v1127_v19 }
 0x235   : > { %1183 = vmatpush1.bf16.msra.mxu1 %v3052_v23 }
 0x236   : > { %1184 = vmatprep.subr.bf16.mxu1 %v1129_v44  ;;  %v1226_v44 = vld [vmem:[%s2791_s11 + $0x18] sm:$0xff] }
 0x239   : > { %1185 = vmatpush1.bf16.msra.mxu1 %v3055_v3 }
 0x23a   : > { %1186 = vmatprep.subr.bf16.mxu1 %v1131_v16 }
 0x23d   : > { %1187 = vmatpush1.bf16.msra.mxu1 %v3058_v34 }
 0x23e   : > { %1188 = vmatprep.subr.bf16.mxu1 %v1133_v24 }
 0x241   : > { %1189 = vmatpush1.bf16.msra.mxu1 %v3059_v0 }
 0x242   : > { %1190 = vmatprep.subr.bf16.mxu1 %v1135_v61 }
 0x245   : > { %1191 = vmatpush1.bf16.msra.mxu1 %v3060_v46 }
 0x248   : > { %1193 = vmatmul.mubr.bf16.vlgmr.msra.gmra.mrb[0].mxu1 %v1529_v18 }
 0x249   : > { %1202 = vmatprep.mubr.bf16.mxu1 %v1532_v41 }
 0x250   : > { %1203 = vmatmul.mubr.bf16.gmra.mrb[4].mxu1 %v1534_v12 }
 0x31b   : > { %v1194_v58 = vpop.f32.mrb[0].mxu1 }
 0x31c   : > { %v1215_v45 = vmul.f32 %v1214_v47, %v1194_v58  ;;  %v1196_v2 = vpop.f32.mrb[1].mxu1 }
 0x31d   : > { %v1216_v30 = vmul.f32 %v1214_v47, %v1196_v2  ;;  %v1198_v4 = vpop.f32.mrb[2].mxu1 }
 0x31e   : > { %v1231_v22 = vadd.f32 %v1223_v63, %v1215_v45  ;;  %v1217_v6 = vmul.f32 %v1214_v47, %v1198_v4  ;;  %v1200_v19 = vpop.f32.mrb[3].mxu1 }
 0x31f   : > { %v1232_v54 = vadd.f32 %v1224_v26, %v1216_v30  ;;  %v1218_v38 = vmul.f32 %v1214_v47, %v1200_v19 }
 0x320   : > { %1239 = vst [vmem:[%s299_s8] sm:$0xff] %v1231_v22  ;;  %v1233_v21 = vadd.f32 %v1225_v53, %v1217_v6 }
 0x321   : > { %1240 = vst [vmem:[%s299_s8 + $0x8] sm:$0xff] %v1232_v54  ;;  %v1234_v15 = vadd.f32 %v1226_v44, %v1218_v38 }
 0x322   : > { %1241 = vst [vmem:[%s299_s8 + $0x10] sm:$0xff] %v1233_v21 }
 0x323   : > { %1242 = vst [vmem:[%s299_s8 + $0x18] sm:$0xff] %v1234_v15  ;;  %v1204_v16 = vpop.f32.mrb[4].mxu1 }
 0x324   : > { %v1219_v56 = vmul.f32 %v1214_v47, %v1204_v16  ;;  %v1206_v39 = vpop.f32.mrb[5].mxu1 }
 0x325   : > { %v1220_v24 = vmul.f32 %v1214_v47, %v1206_v39  ;;  %v1208_v61 = vpop.f32.mrb[6].mxu1 }
 0x326   : > { %v1235_v60 = vadd.f32 %v1227_v50, %v1219_v56  ;;  %v1221_v35 = vmul.f32 %v1214_v47, %v1208_v61  ;;  %v1210_v40 = vpop.f32.mrb[7].mxu1 }
 0x327   : > { %v1236_v49 = vadd.f32 %v1228_v32, %v1220_v24  ;;  %v1222_v52 = vmul.f32 %v1214_v47, %v1210_v40 }
 0x328   : > { %1243 = vst [vmem:[%s299_s8 + $0x20] sm:$0xff] %v1235_v60  ;;  %v1237_v8 = vadd.f32 %v1229_v27, %v1221_v35 }
 0x329   : > { %1244 = vst [vmem:[%s299_s8 + $0x28] sm:$0xff] %v1236_v49  ;;  %v1238_v33 = vadd.f32 %v1230_v28, %v1222_v52 }
 0x32a   : > { %1245 = vst [vmem:[%s299_s8 + $0x30] sm:$0xff] %v1237_v8 }
 0x32b   : > { %1246 = vst [vmem:[%s299_s8 + $0x38] sm:$0xff] %v1238_v33 }
 0x32c   : > { %1680 = shalt.err (!%p1677_p5)
}
 0x32d   : > { %s1681_s28 = scalar_lea.hbm %s2807_s17, 1024  ;;  %s1685_s10 = scalar_lea.hbm %s2864_s5, 2048 }
 0x32e   : > { %p1682_p6 = scmp.ne.s32.totalorder %s2807_s17, %s1681_s28  ;;  %p1686_p10 = scmp.lt.u32.totalorder %s2807_s17, %s2864_s5 }
 0x32f   : > { %p1687_p11 = scmp.lt.u32.totalorder %s1685_s10, %s1681_s28  ;;  %p1689_p13 = scmp.lt.u32.totalorder %s1681_s28, %s2807_s17 }
 0x330   : > { %p1683_p7 = pnand %p1682_p6, %p1824_p4 }
 0x331   : > { %p1688_p12 = por %p1687_p11, %p1686_p10 }
 0x332   : > { %p1684_p9 = pneg %p1683_p7 }
 0x333   : > { %p1690_p0 = por %p1689_p13, %p1688_p12 }
 0x335   : > { %p1691_p1 = pnand %p1690_p0, %p1684_p9 }
 0x337   : > { %1694 = shalt.err (!%p1691_p1)
}
 0x338   : > { %s1749_s8 = smov 256   ;;  %s1750_s13 = smov 16  }
 0x339   : > { %1452 = dma.vmem_to_hbm [thread:$0]  (%p1824_p4), %s2809_s14, 1024, %s2807_s17, %s2813_s23, %s1749_s8, %s1749_s8, %s1750_s13  }
 0x33a PF: > { %p1458_p2 = scmp.ge.s32.totalorder %s1745_s25, 2  ;;  %s1278_s15 = sand.u32 1, %s1725_s20  }
 0x33b   : > { %s1279_s16 = scalar_lea.sflag [#allocation4], %s1278_s15 }
 0x33c   : > { %p1455_p3 = pnand %p1458_p2, %p1831_p8 }
 0x33e   : > { %1720 = dma.done.wait (!%p1455_p3), %s1279_s16, 1024  }
 0x33f   : > { %1722 = vsyncadd (!%p1455_p3), %s1279_s16, 4294966272  ;;  %s19_s25 = sadd.s32 1, %s1745_s25   ;;  %s3061_s20 = smov %s1729_s21 }
 0x340   : > { %p16_p5 = scmp.ge.s32.totalorder %s19_s25, 4   ;;  %s3062_s21 = smov %s1733_s22 }
 0x341   : > { %s3063_s22 = smov %s1837_s7  ;;  %s3064_s23 = smov %s1741_s24 }
 0x342   : > { %s3065_s24 = smov %s3067_s27  ;;  %18 = sbr.rel (!%p16_p5) target bundleno = 6 (0x6), region = 84 }
 0x349   :  { %1284 = vsyncpa [#allocation4], 1 }
 0x34a   :  { %1286 = vsyncpa [#allocation4 + $0x1], 1 }

// kernel: tpu_custom_call.1
= control target key start
LH: loop header
LB: loop body
LE: loop exit
PB: predicated region body
PF: predicated region fallthrough
CT: control target
= control target key end

     0   :  { %s2853_s0 = inlined_call_operand.vmem [shape: f32[2,32,256], index: 0, kind: input, shape index: {}]   ;;  %s2854_s1 = inlined_call_operand.vmem [shape: bf16[2,16,256], index: 1, kind: input, shape index: {}]   ;;  %s2855_s2 = inlined_call_operand.vmem [shape: bf16[2,256,16], index: 2, kind: input, shape index: {}]   ;;  %s2856_s3 = inlined_call_operand.vmem [shape: bf16[2,32,256], index: 3, kind: input, shape index: {}]   ;;  %s2857_s4 = inlined_call_operand.<no memory space> [shape: f32[1], index: 4, kind: input, shape index: {}]   ;;  %s2858_s5 = inlined_call_operand.hbm [shape: f32[2,32,256], index: 5, kind: output, shape index: {}]  }
   0x1   :  { %10 = sst [smem:[#allocation2]] %s2857_s4 }
   0x2   :  { %11 = vsyncpa [#allocation4], 0 }
   0x3   :  { %13 = vsyncpa [#allocation4 + $0x1], 0  ;;  %s1778_s20 = smov 0   ;;  %s1780_s21 = smov 0  }
   0x4   :  { %s1782_s22 = smov 0   ;;  %s1784_s23 = smov 0  }
   0x5   :  { %s1786_s24 = smov 0   ;;  %s1788_s25 = smov 0  }
   0x6 LB: > { %s1384_s4 = sadd.s32 4294967295, %s1739_s25   ;;  %s1385_s26 = sadd.s32 4294967294, %s1739_s25   ;;  %s1739_s25 = sphi %s1788_s25, %s19_s25   ;;  %s1735_s24 = sphi %s1786_s24, %s3059_s24   ;;  %s1731_s23 = sphi %s1784_s23, %s3058_s23   ;;  %s1727_s22 = sphi %s1782_s22, %s3057_s22   ;;  %s1723_s21 = sphi %s1780_s21, %s3056_s21   ;;  %s1719_s20 = sphi %s1778_s20, %s3055_s20  }
   0x7   : > { %s31_s27 = sadd.s32 1, %s1735_s24  ;;  %s169_s28 = sadd.s32 1, %s1727_s22 }
   0x8   : > { %p33_p0 = scmp.ge.s32.totalorder %s31_s27, 2  ;;  %p179_p1 = scmp.ne.s32.totalorder %s1727_s22, %s1723_s21 }
   0x9   : > { %p180_p2 = scmp.eq.s32.totalorder %s1384_s4, 1  ;;  %p185_p3 = scmp.ne.s32.totalorder %s1723_s21, %s1719_s20 }
   0xa   : > { %s3061_s27 = smov (%p33_p0, %s31_s27), 0  ;;  %p186_p5 = scmp.eq.s32.totalorder %s1385_s26, 1 }
   0xb   : > { %p1818_p4 = por %p180_p2, %p179_p1  ;;  %s164_s30 = ssub.s32 %s1735_s24, %s3061_s27 }
   0xc   : > { %p1388_p6 = scmp.ge.s32.totalorder %s1739_s25, 1  ;;  %p167_p7 = scmp.eq.s32.totalorder %s164_s30, 0 }
   0xd   : > { %p1825_p8 = por %p186_p5, %p185_p3  ;;  %p249_p9 = scmp.lt.s32.totalorder %s1739_s25, 3 }
   0xe   : > { %s1831_s7 = scalar_select %p167_p7, %s1727_s22, %s169_s28  }
   0xf   : > { %p250_p10 = pnand %p1388_p6, %p249_p9 }
  0x11   : > { %253 = sbr.rel (%p250_p10) target bundleno = 826 (0x33a), region = 40 }
  0x18   : > { %p301_p11 = scmp.lt.s32.totalorder %s1731_s23, 1  ;;  %v1741_v0 = vmov 0   ;;  %vm456_vm0 = vcmask 130048   ;;  %s1213_s26 = sld [smem:[#allocation2]] }
  0x19   : > { %537 = vmatprep.mubr.bf16.mxu0 %v1741_v0  ;;  %s297_s30 = sand.u32 1, %s1723_s21   ;;  %s1742_s19 = smov [#allocation3]  }
  0x1a   : > { %s1835_s8 = scalar_select %p301_p11, %s1731_s23, 1 }
  0x1c   : > { %s1442_s9 = sshll.u32 %s1835_s8, 4  ;;  %s1443_s13 = sshll.u32 %s1835_s8, 7 }
  0x1d   : > { %s318_s12 = scalar_lea.vmem %s2854_s1, %s1442_s9  ;;  %s1845_s16 = scalar_lea.vmem %s2855_s2, %s1443_s13 }
  0x1e   : > { %v1504_v1 = vld [vmem:[%s318_s12 + $0x4] ss:$8 sps:$4 sm:$0xff]   ;;  %v1506_v2 = vld [vmem:[%s318_s12] ss:$8 sps:$4 sm:$0xff]   ;;  %v1509_v5 = vld [vmem:[%s1845_s16 + $0x10] sm:$0xff]   ;;  %s1444_s17 = sshll.u32 %s1835_s8, 5 }
  0x1f   : > { %505 = vmatprep.subr.bf16.mxu0 %v1504_v1  ;;  %v1507_v3 = vld [vmem:[%s1845_s16] sm:$0xff]   ;;  %v1508_v4 = vld [vmem:[%s1845_s16 + $0x8] sm:$0xff]   ;;  %v1510_v6 = vld [vmem:[%s1845_s16 + $0x18] sm:$0xff]   ;;  %s2463_s4 = scalar_lea.vmem %s2856_s3, %s1444_s17  ;;  %s1441_s28 = sshll.u32 %s1835_s8, 6 }
  0x20   : > { %506 = vmatpush1.bf16.msra.mxu0 %v1506_v2  ;;  %v1511_v7 = vld [vmem:[%s1845_s16 + $0x20] sm:$0xff]   ;;  %v1512_v8 = vld [vmem:[%s1845_s16 + $0x28] sm:$0xff]   ;;  %v1513_v9 = vld [vmem:[%s1845_s16 + $0x30] sm:$0xff]   ;;  %s2785_s11 = scalar_lea.vmem %s2853_s0, %s1441_s28  ;;  %s1389_s12 = sshll.u32 %s297_s30, 6 }
  0x21   : > { %v1514_v10 = vld [vmem:[%s1845_s16 + $0x38] sm:$0xff]   ;;  %v1515_v11 = vld [vmem:[%s1845_s16 + $0x40] sm:$0xff]   ;;  %v1516_v12 = vld [vmem:[%s1845_s16 + $0x48] sm:$0xff]   ;;  %s299_s8 = scalar_lea.vmem [#allocation3], %s1389_s12  ;;  %s1445_s13 = sshll.u32 %s1731_s23, 10 }
  0x22   : > { %v1517_v13 = vld [vmem:[%s1845_s16 + $0x50] sm:$0xff]   ;;  %v1518_v14 = vld [vmem:[%s1845_s16 + $0x58] sm:$0xff]   ;;  %v1519_v15 = vld [vmem:[%s1845_s16 + $0x60] sm:$0xff]   ;;  %s1263_s14 = sshll.u32 %s299_s8, 4  ;;  %s2801_s17 = scalar_lea.hbm %s2858_s5, %s1445_s13  ;;  %s2803_s14 = int_to_ptr.vmem [resolvable:$true] %s1263_s14 }
  0x23   : > { %1416 = vmatmul.mubr.msk.bf16.vlgmr.msra.gmra.mrb[0].mxu0 %vm456_vm0, %v1507_v3  ;;  %v1520_v16 = vld [vmem:[%s1845_s16 + $0x68] sm:$0xff]   ;;  %v1521_v17 = vld [vmem:[%s1845_s16 + $0x70] sm:$0xff]   ;;  %v1522_v18 = vld [vmem:[%s1845_s16 + $0x78] sm:$0xff]   ;;  %s2807_s23 = scalar_lea.sflag [#allocation4], %s297_s30  ;;  %s1661_s18 = scalar_lea.vmem %s2803_s14, 1024 }
  0x24   : > { %547 = vmatprep.mubr.bf16.mxu0 %v1741_v0  ;;  %p1662_p12 = scmp.ne.s32.totalorder %s2803_s14, %s1661_s18 }
  0x26   : > { %p1663_p13 = pnand %p1662_p12, %p1818_p4 }
  0x28   : > { %p1664_p0 = pneg %p1663_p13 }
  0x2b   : > { %1417 = vmatmul.mubr.msk.bf16.gmra.mrb[4].mxu0 %vm456_vm0, %v1508_v4 }
  0x2c   : > { %557 = vmatprep.mubr.bf16.mxu0 %v1741_v0 }
  0x33   : > { %1418 = vmatmul.mubr.msk.bf16.gmra.mrb[8].mxu0 %vm456_vm0, %v1509_v5 }
  0x34   : > { %567 = vmatprep.mubr.bf16.mxu0 %v1741_v0 }
  0x3b   : > { %1419 = vmatmul.mubr.msk.bf16.gmra.mrb[12].mxu0 %vm456_vm0, %v1510_v6 }
  0x3c   : > { %577 = vmatprep.mubr.bf16.mxu0 %v1741_v0 }
  0x43   : > { %1420 = vmatmul.mubr.msk.bf16.gmra.mrb[16].mxu0 %vm456_vm0, %v1511_v7 }
  0x44   : > { %587 = vmatprep.mubr.bf16.mxu0 %v1741_v0 }
  0x4b   : > { %1421 = vmatmul.mubr.msk.bf16.gmra.mrb[20].mxu0 %vm456_vm0, %v1512_v8 }
  0x4c   : > { %597 = vmatprep.mubr.bf16.mxu0 %v1741_v0 }
  0x53   : > { %1422 = vmatmul.mubr.msk.bf16.gmra.mrb[24].mxu0 %vm456_vm0, %v1513_v9 }
  0x54   : > { %607 = vmatprep.mubr.bf16.mxu0 %v1741_v0 }
  0x5b   : > { %1423 = vmatmul.mubr.msk.bf16.gmra.mrb[28].mxu0 %vm456_vm0, %v1514_v10 }
  0x5c   : > { %617 = vmatprep.mubr.bf16.mxu0 %v1741_v0 }
  0x63   : > { %1424 = vmatmul.mubr.msk.bf16.gmra.mrb[32].mxu0 %vm456_vm0, %v1515_v11 }
  0x64   : > { %627 = vmatprep.mubr.bf16.mxu0 %v1741_v0 }
  0x6b   : > { %1425 = vmatmul.mubr.msk.bf16.gmra.mrb[36].mxu0 %vm456_vm0, %v1516_v12 }
  0x6c   : > { %637 = vmatprep.mubr.bf16.mxu0 %v1741_v0 }
  0x73   : > { %1426 = vmatmul.mubr.msk.bf16.gmra.mrb[40].mxu0 %vm456_vm0, %v1517_v13 }
  0x74   : > { %647 = vmatprep.mubr.bf16.mxu0 %v1741_v0 }
  0x7b   : > { %1427 = vmatmul.mubr.msk.bf16.gmra.mrb[44].mxu0 %vm456_vm0, %v1518_v14 }
  0x7c   : > { %657 = vmatprep.mubr.bf16.mxu0 %v1741_v0 }
  0x83   : > { %1428 = vmatmul.mubr.msk.bf16.gmra.mrb[48].mxu0 %vm456_vm0, %v1519_v15 }
  0x84   : > { %667 = vmatprep.mubr.bf16.mxu0 %v1741_v0 }
  0x8b   : > { %1429 = vmatmul.mubr.msk.bf16.gmra.mrb[52].mxu0 %vm456_vm0, %v1520_v16 }
  0x8c   : > { %677 = vmatprep.mubr.bf16.mxu0 %v1741_v0 }
  0x93   : > { %1430 = vmatmul.mubr.msk.bf16.gmra.mrb[56].mxu0 %vm456_vm0, %v1521_v17 }
  0x94   : > { %687 = vmatprep.mubr.bf16.mxu0 %v1741_v0 }
  0x9b   : > { %1431 = vmatmul.mubr.msk.bf16.gmra.mrb[60].mxu0 %vm456_vm0, %v1522_v18 }
  0xf6   : > { %v1879_v19 = vpop.f32.mrb[0].mxu0 }
  0xf7   : > { %v1881_v20 = vpop.f32.mrb[1].mxu0 }
  0xf8   : > { %v1883_v21 = vpop.f32.mrb[2].mxu0 }
  0xf9   : > { %v1885_v22 = vpop.f32.mrb[3].mxu0 }
  0xfe   : > { %v1887_v23 = vpop.f32.mrb[4].mxu0 }
  0xff   : > { %v698_v24 = vmax.f32 %v1879_v19, %v1887_v23  ;;  %v1891_v25 = vpop.f32.mrb[5].mxu0 }
 0x100   : > { %v735_v26 = vmax.f32 %v1881_v20, %v1891_v25  ;;  %v1895_v27 = vpop.f32.mrb[6].mxu0 }
 0x101   : > { %v699_v28 = vmax.f32 %v1883_v21, %v1895_v27  ;;  %v1899_v29 = vpop.f32.mrb[7].mxu0 }
 0x102   : > { %v736_v30 = vmax.f32 %v1885_v22, %v1899_v29 }
 0x106   : > { %v1903_v31 = vpop.f32.mrb[8].mxu0 }
 0x107   : > { %v700_v32 = vmax.f32 %v698_v24, %v1903_v31  ;;  %v1906_v33 = vpop.f32.mrb[9].mxu0 }
 0x108   : > { %v737_v34 = vmax.f32 %v735_v26, %v1906_v33  ;;  %v1909_v35 = vpop.f32.mrb[10].mxu0 }
 0x109   : > { %v701_v36 = vmax.f32 %v699_v28, %v1909_v35  ;;  %v1912_v37 = vpop.f32.mrb[11].mxu0 }
 0x10a   : > { %v738_v38 = vmax.f32 %v736_v30, %v1912_v37 }
 0x10e   : > { %v1915_v39 = vpop.f32.mrb[12].mxu0 }
 0x10f   : > { %v702_v40 = vmax.f32 %v700_v32, %v1915_v39  ;;  %v1918_v41 = vpop.f32.mrb[13].mxu0 }
 0x110   : > { %v739_v42 = vmax.f32 %v737_v34, %v1918_v41  ;;  %v1921_v43 = vpop.f32.mrb[14].mxu0 }
 0x111   : > { %v703_v44 = vmax.f32 %v701_v36, %v1921_v43  ;;  %v1924_v45 = vpop.f32.mrb[15].mxu0 }
 0x112   : > { %v740_v46 = vmax.f32 %v738_v38, %v1924_v45 }
 0x116   : > { %v1927_v47 = vpop.f32.mrb[16].mxu0 }
 0x117   : > { %v704_v48 = vmax.f32 %v702_v40, %v1927_v47  ;;  %v1930_v49 = vpop.f32.mrb[17].mxu0 }
 0x118   : > { %v741_v50 = vmax.f32 %v739_v42, %v1930_v49  ;;  %v1933_v51 = vpop.f32.mrb[18].mxu0 }
 0x119   : > { %v705_v52 = vmax.f32 %v703_v44, %v1933_v51  ;;  %v1936_v53 = vpop.f32.mrb[19].mxu0 }
 0x11a   : > { %v742_v54 = vmax.f32 %v740_v46, %v1936_v53 }
 0x11e   : > { %v1939_v55 = vpop.f32.mrb[20].mxu0 }
 0x11f   : > { %v706_v56 = vmax.f32 %v704_v48, %v1939_v55  ;;  %v1942_v57 = vpop.f32.mrb[21].mxu0 }
 0x120   : > { %v743_v58 = vmax.f32 %v741_v50, %v1942_v57  ;;  %v1945_v59 = vpop.f32.mrb[22].mxu0 }
 0x121   : > { %v707_v60 = vmax.f32 %v705_v52, %v1945_v59  ;;  %v1948_v61 = vpop.f32.mrb[23].mxu0 }
 0x122   : > { %2918 = vst [vmem:[#allocation6_spill] sm:$0xff] %v1948_v61  ;;  %v744_v62 = vmax.f32 %v742_v54, %v1948_v61 }
 0x126   : > { %v1951_v63 = vpop.f32.mrb[24].mxu0 }
 0x127   : > { %v708_v0 = vmax.f32 %v706_v56, %v1951_v63  ;;  %v1954_v1 = vpop.f32.mrb[25].mxu0 }
 0x128   : > { %2919 = vst [vmem:[#allocation7_spill] sm:$0xff] %v1954_v1  ;;  %v745_v2 = vmax.f32 %v743_v58, %v1954_v1  ;;  %v1957_v3 = vpop.f32.mrb[26].mxu0 }
 0x129   : > { %v709_v4 = vmax.f32 %v707_v60, %v1957_v3  ;;  %v1960_v5 = vpop.f32.mrb[27].mxu0 }
 0x12a   : > { %2920 = vst [vmem:[#allocation8_spill] sm:$0xff] %v1960_v5  ;;  %v746_v6 = vmax.f32 %v744_v62, %v1960_v5 }
 0x12e   : > { %v1963_v7 = vpop.f32.mrb[28].mxu0 }
 0x12f   : > { %v710_v8 = vmax.f32 %v708_v0, %v1963_v7  ;;  %v1966_v9 = vpop.f32.mrb[29].mxu0 }
 0x130   : > { %2921 = vst [vmem:[#allocation9_spill] sm:$0xff] %v1966_v9  ;;  %v747_v10 = vmax.f32 %v745_v2, %v1966_v9  ;;  %v1969_v11 = vpop.f32.mrb[30].mxu0 }
 0x131   : > { %v711_v12 = vmax.f32 %v709_v4, %v1969_v11  ;;  %v1972_v13 = vpop.f32.mrb[31].mxu0 }
 0x132   : > { %2922 = vst [vmem:[#allocation10_spill] sm:$0xff] %v1972_v13  ;;  %v748_v14 = vmax.f32 %v746_v6, %v1972_v13 }
 0x136   : > { %v1975_v15 = vpop.f32.mrb[32].mxu0 }
 0x137   : > { %v712_v16 = vmax.f32 %v710_v8, %v1975_v15  ;;  %v1978_v17 = vpop.f32.mrb[33].mxu0 }
 0x138   : > { %2923 = vst [vmem:[#allocation11_spill] sm:$0xff] %v1978_v17  ;;  %v749_v18 = vmax.f32 %v747_v10, %v1978_v17  ;;  %v1981_v24 = vpop.f32.mrb[34].mxu0 }
 0x139   : > { %v713_v26 = vmax.f32 %v711_v12, %v1981_v24  ;;  %v1984_v28 = vpop.f32.mrb[35].mxu0 }
 0x13a   : > { %2924 = vst [vmem:[#allocation12_spill] sm:$0xff] %v1984_v28  ;;  %v750_v30 = vmax.f32 %v748_v14, %v1984_v28 }
 0x13e   : > { %v1987_v32 = vpop.f32.mrb[36].mxu0 }
 0x13f   : > { %v714_v34 = vmax.f32 %v712_v16, %v1987_v32  ;;  %v1990_v36 = vpop.f32.mrb[37].mxu0 }
 0x140   : > { %2925 = vst [vmem:[#allocation13_spill] sm:$0xff] %v1990_v36  ;;  %v751_v38 = vmax.f32 %v749_v18, %v1990_v36  ;;  %v1993_v40 = vpop.f32.mrb[38].mxu0 }
 0x141   : > { %v715_v42 = vmax.f32 %v713_v26, %v1993_v40  ;;  %v1996_v44 = vpop.f32.mrb[39].mxu0 }
 0x142   : > { %2926 = vst [vmem:[#allocation14_spill] sm:$0xff] %v1996_v44  ;;  %v752_v46 = vmax.f32 %v750_v30, %v1996_v44 }
 0x146   : > { %v1999_v48 = vpop.f32.mrb[40].mxu0 }
 0x147   : > { %v716_v50 = vmax.f32 %v714_v34, %v1999_v48  ;;  %v2002_v52 = vpop.f32.mrb[41].mxu0 }
 0x148   : > { %2927 = vst [vmem:[#allocation15_spill] sm:$0xff] %v2002_v52  ;;  %v753_v54 = vmax.f32 %v751_v38, %v2002_v52  ;;  %v2005_v56 = vpop.f32.mrb[42].mxu0 }
 0x149   : > { %v717_v58 = vmax.f32 %v715_v42, %v2005_v56  ;;  %v2008_v60 = vpop.f32.mrb[43].mxu0 }
 0x14a   : > { %2928 = vst [vmem:[#allocation16_spill] sm:$0xff] %v2008_v60  ;;  %v754_v62 = vmax.f32 %v752_v46, %v2008_v60 }
 0x14e   : > { %v2011_v0 = vpop.f32.mrb[44].mxu0 }
 0x14f   : > { %v718_v2 = vmax.f32 %v716_v50, %v2011_v0  ;;  %v2014_v4 = vpop.f32.mrb[45].mxu0 }
 0x150   : > { %2929 = vst [vmem:[#allocation17_spill] sm:$0xff] %v2014_v4  ;;  %v755_v6 = vmax.f32 %v753_v54, %v2014_v4  ;;  %v2017_v8 = vpop.f32.mrb[46].mxu0 }
 0x151   : > { %v719_v10 = vmax.f32 %v717_v58, %v2017_v8  ;;  %v2020_v12 = vpop.f32.mrb[47].mxu0 }
 0x152   : > { %2930 = vst [vmem:[#allocation18_spill] sm:$0xff] %v2020_v12  ;;  %v756_v14 = vmax.f32 %v754_v62, %v2020_v12 }
 0x156   : > { %v2023_v16 = vpop.f32.mrb[48].mxu0 }
 0x157   : > { %v720_v18 = vmax.f32 %v718_v2, %v2023_v16  ;;  %v2026_v26 = vpop.f32.mrb[49].mxu0 }
 0x158   : > { %2931 = vst [vmem:[#allocation19_spill] sm:$0xff] %v2026_v26  ;;  %v757_v30 = vmax.f32 %v755_v6, %v2026_v26  ;;  %v2029_v34 = vpop.f32.mrb[50].mxu0 }
 0x159   : > { %v721_v38 = vmax.f32 %v719_v10, %v2029_v34  ;;  %v2032_v42 = vpop.f32.mrb[51].mxu0 }
 0x15a   : > { %2932 = vst [vmem:[#allocation20_spill] sm:$0xff] %v2032_v42  ;;  %v758_v46 = vmax.f32 %v756_v14, %v2032_v42 }
 0x15e   : > { %v2035_v50 = vpop.f32.mrb[52].mxu0 }
 0x15f   : > { %v722_v54 = vmax.f32 %v720_v18, %v2035_v50  ;;  %v2038_v58 = vpop.f32.mrb[53].mxu0 }
 0x160   : > { %2933 = vst [vmem:[#allocation21_spill] sm:$0xff] %v2038_v58  ;;  %v759_v62 = vmax.f32 %v757_v30, %v2038_v58  ;;  %v2041_v2 = vpop.f32.mrb[54].mxu0 }
 0x161   : > { %v723_v6 = vmax.f32 %v721_v38, %v2041_v2  ;;  %v2044_v26 = vpop.f32.mrb[55].mxu0 }
 0x162   : > { %2934 = vst [vmem:[#allocation22_spill] sm:$0xff] %v2044_v26  ;;  %v760_v10 = vmax.f32 %v758_v46, %v2044_v26 }
 0x166   : > { %v2047_v12 = vpop.f32.mrb[56].mxu0 }
 0x167   : > { %v724_v14 = vmax.f32 %v722_v54, %v2047_v12  ;;  %v2050_v42 = vpop.f32.mrb[57].mxu0 }
 0x168   : > { %2935 = vst [vmem:[#allocation23_spill] sm:$0xff] %v2050_v42  ;;  %v761_v18 = vmax.f32 %v759_v62, %v2050_v42  ;;  %v2053_v4 = vpop.f32.mrb[58].mxu0 }
 0x169   : > { %v725_v30 = vmax.f32 %v723_v6, %v2053_v4  ;;  %v2056_v58 = vpop.f32.mrb[59].mxu0 }
 0x16a   : > { %2936 = vst [vmem:[#allocation24_spill] sm:$0xff] %v2056_v58  ;;  %v762_v38 = vmax.f32 %v760_v10, %v2056_v58 }
 0x16e   : > { %v2059_v60 = vpop.f32.mrb[60].mxu0 }
 0x16f   : > { %v726_v46 = vmax.f32 %v724_v14, %v2059_v60  ;;  %v2062_v26 = vpop.f32.mrb[61].mxu0 }
 0x170   : > { %2937 = vst [vmem:[#allocation25_spill] sm:$0xff] %v2062_v26  ;;  %v763_v54 = vmax.f32 %v761_v18, %v2062_v26  ;;  %v2065_v52 = vpop.f32.mrb[62].mxu0 }
 0x171   : > { %v727_v62 = vmax.f32 %v725_v30, %v2065_v52  ;;  %v2068_v42 = vpop.f32.mrb[63].mxu0 }
 0x172   : > { %2938 = vst [vmem:[#allocation26_spill] sm:$0xff] %v2068_v42  ;;  %v764_v6 = vmax.f32 %v762_v38, %v2068_v42 }
 0x173   : > { %v728_v44 = vmax.f32 %v726_v46, %v727_v62 }
 0x174   : > { %v765_v36 = vmax.f32 %v763_v54, %v764_v6 }
 0x175   : > { %v729_v28 = vrot.slane %v728_v44, 4 }
 0x176   : > { %v766_v10 = vrot.slane %v765_v36, 4 }
 0x177   : > { %v730_v58 = vmax.f32 %v728_v44, %v729_v28 }
 0x178   : > { %v767_v17 = vmax.f32 %v765_v36, %v766_v10 }
 0x179   : > { %v731_v13 = vrot.slane %v730_v58, 2 }
 0x17a   : > { %v768_v14 = vrot.slane %v767_v17, 2 }
 0x17b   : > { %v732_v9 = vmax.f32 %v730_v58, %v731_v13 }
 0x17c   : > { %v769_v5 = vmax.f32 %v767_v17, %v768_v14 }
 0x17d   : > { %v733_v1 = vrot.slane %v732_v9, 1 }
 0x17e   : > { %v770_v18 = vrot.slane %v769_v5, 1 }
 0x17f   : > { %v2071_v26 = vmax.f32 %v732_v9, %v733_v1 }
 0x180   : > { %v2073_v61 = vmax.f32 %v769_v5, %v770_v18 }
 0x181   : > { %v772_v30 = vsub.f32 %v1879_v19, %v2071_v26  ;;  %v774_v38 = vsub.f32 %v1883_v21, %v2071_v26  ;;  %v776_v28 = vsub.f32 %v1887_v23, %v2071_v26  ;;  %v778_v36 = vsub.f32 %v1895_v27, %v2071_v26 }
 0x182   : > { %v780_v13 = vsub.f32 %v1903_v31, %v2071_v26  ;;  %v782_v1 = vsub.f32 %v1909_v35, %v2071_v26  ;;  %v784_v5 = vsub.f32 %v1915_v39, %v2071_v26  ;;  %v786_v19 = vsub.f32 %v1921_v43, %v2071_v26  ;;  %v2961_v39 = vld [vmem:[#allocation22_spill] sm:$0xff] }
 0x183   : > { %v788_v21 = vsub.f32 %v1927_v47, %v2071_v26  ;;  %v790_v23 = vsub.f32 %v1933_v51, %v2071_v26  ;;  %v792_v27 = vsub.f32 %v1939_v55, %v2071_v26  ;;  %v794_v31 = vsub.f32 %v1945_v59, %v2071_v26  ;;  %v2954_v55 = vld [vmem:[#allocation17_spill] sm:$0xff]  ;;  %v2957_v47 = vld [vmem:[#allocation19_spill] sm:$0xff] }
 0x184   : > { %v836_v58 = vmul.f32 1.442695, %v772_v30  ;;  %v840_v6 = vmul.f32 1.442695, %v774_v38  ;;  %v844_v44 = vmul.f32 1.442695, %v776_v28  ;;  %v2966_v59 = vsub.f32 %v1963_v7, %v2071_v26 }
 0x185   : > { %v848_v18 = vmul.f32 1.442695, %v778_v36  ;;  %v852_v46 = vmul.f32 1.442695, %v780_v13  ;;  %v856_v17 = vmul.f32 1.442695, %v782_v1  ;;  %v2969_v7 = vsub.f32 %v1981_v24, %v2071_v26 }
 0x186   : > { %1529 = vpow2.f32 %v836_v58  ;;  %v860_v54 = vmul.f32 1.442695, %v784_v5  ;;  %v864_v9 = vmul.f32 1.442695, %v786_v19  ;;  %v868_v13 = vmul.f32 1.442695, %v788_v21 }
 0x187   : > { %1531 = vpow2.f32 %v840_v6  ;;  %v2941_v21 = vld [vmem:[#allocation6_spill] sm:$0xff]  ;;  %v2942_v5 = vld [vmem:[#allocation7_spill] sm:$0xff]  ;;  %v2943_v19 = vld [vmem:[#allocation8_spill] sm:$0xff]  ;;  %v876_v30 = vmul.f32 1.442695, %v792_v27 }
 0x188   : > { %1533 = vpow2.f32 %v844_v44  ;;  %v2945_v58 = vld [vmem:[#allocation9_spill] sm:$0xff]  ;;  %v2948_v1 = vld [vmem:[#allocation12_spill] sm:$0xff]  ;;  %v2952_v38 = vld [vmem:[#allocation15_spill] sm:$0xff]  ;;  %v892_v28 = vmul.f32 1.442695, %v2966_v59 }
 0x189   : > { %1535 = vpow2.f32 %v848_v18  ;;  %v872_v18 = vmul.f32 1.442695, %v790_v23  ;;  %v2947_v23 = vld [vmem:[#allocation11_spill] sm:$0xff]  ;;  %v2949_v36 = vld [vmem:[#allocation13_spill] sm:$0xff]  ;;  %v2953_v6 = vld [vmem:[#allocation16_spill] sm:$0xff] }
 0x18a   : > { %1537 = vpow2.f32 %v852_v46  ;;  %v2946_v46 = vld [vmem:[#allocation10_spill] sm:$0xff]  ;;  %v2958_v27 = vld [vmem:[#allocation20_spill] sm:$0xff]  ;;  %v904_v59 = vmul.f32 1.442695, %v2969_v7 }
 0x18b   : > { %1539 = vpow2.f32 %v856_v17 }
 0x18c   : > { %1541 = vpow2.f32 %v860_v54 }
 0x18d   : > { %1543 = vpow2.f32 %v864_v9  ;;  %v2951_v9 = vld [vmem:[#allocation14_spill] sm:$0xff] }
 0x18e   : > { %1545 = vpow2.f32 %v868_v13 }
 0x18f   : > { %1547 = vpow2.f32 %v872_v18  ;;  %v2962_v18 = vld [vmem:[#allocation23_spill] sm:$0xff] }
 0x190   : > { %v2151_v44 = vpop.eup %1529  ;;  %1549 = vpow2.f32 %v876_v30 }
 0x191   : > { %2939 = vst [vmem:[#allocation27_spill] sm:$0xff] %v2151_v44  ;;  %v2159_v17 = vpop.eup %1531 }
 0x192   : > { %2940 = vst [vmem:[#allocation28_spill] sm:$0xff] %v2159_v17  ;;  %v964_v62 = vadd.f32 %v2159_v17, %v2151_v44  ;;  %v2173_v54 = vpop.eup %1533  ;;  %v2965_v44 = vsub.f32 %v1957_v3, %v2071_v26  ;;  %v2968_v3 = vsub.f32 %v1975_v15, %v2071_v26  ;;  %v2971_v15 = vsub.f32 %v1885_v22, %v2073_v61 }
 0x193   : > { %2944 = vst [vmem:[#allocation6_spill] sm:$0xff] %v2173_v54  ;;  %v2186_v51 = vpop.eup %1535 }
 0x194   : > { %v965_v14 = vadd.f32 %v2173_v54, %v964_v62  ;;  %2950 = vst [vmem:[#allocation7_spill] sm:$0xff] %v2186_v51  ;;  %v880_v62 = vmul.f32 1.442695, %v794_v31  ;;  %v2202_v35 = vpop.eup %1537  ;;  %v2963_v54 = vld [vmem:[#allocation24_spill] sm:$0xff]  ;;  %v2964_v31 = vld [vmem:[#allocation25_spill] sm:$0xff] }
 0x195   : > { %2956 = vst [vmem:[#allocation8_spill] sm:$0xff] %v2202_v35  ;;  %v2218_v13 = vpop.eup %1539  ;;  %v888_v17 = vmul.f32 1.442695, %v2965_v44  ;;  %v900_v44 = vmul.f32 1.442695, %v2968_v3 }
 0x196   : > { %v966_v10 = vadd.f32 %v2186_v51, %v965_v14  ;;  %v2960_v14 = vsub.f32 %v1951_v63, %v2071_v26  ;;  %1551 = vpow2.f32 %v880_v62 }
 0x198   : > { %v884_v51 = vmul.f32 1.442695, %v2960_v14  ;;  %v967_v43 = vadd.f32 %v2202_v35, %v966_v10  ;;  %v2227_v14 = vpop.eup %1541 }
 0x199   : > { %v2233_v35 = vpop.eup %1543 }
 0x19a   : > { %v968_v10 = vadd.f32 %v2218_v13, %v967_v43  ;;  %1553 = vpow2.f32 %v884_v51  ;;  %v2239_v42 = vpop.eup %1545  ;;  %v2967_v43 = vsub.f32 %v1969_v11, %v2071_v26 }
 0x19b   : > { %1555 = vpow2.f32 %v888_v17  ;;  %v2248_v51 = vpop.eup %1547  ;;  %v2970_v17 = vsub.f32 %v1881_v20, %v2073_v61  ;;  %v2973_v20 = vsub.f32 %v1891_v25, %v2073_v61 }
 0x19c   : > { %v969_v30 = vadd.f32 %v2227_v14, %v968_v10  ;;  %v896_v62 = vmul.f32 1.442695, %v2967_v43  ;;  %1557 = vpow2.f32 %v892_v28  ;;  %v2257_v43 = vpop.eup %1549  ;;  %v2972_v28 = vsub.f32 %v1987_v32, %v2071_v26 }
 0x19d   : > { %v838_v11 = vmul.f32 1.442695, %v2970_v17  ;;  %v2976_v32 = vsub.f32 %v1899_v29, %v2073_v61 }
 0x19e   : > { %v970_v63 = vadd.f32 %v2233_v35, %v969_v30  ;;  %1559 = vpow2.f32 %v896_v62  ;;  %v908_v3 = vmul.f32 1.442695, %v2972_v28  ;;  %v2974_v62 = vsub.f32 %v1993_v40, %v2071_v26 }
 0x19f   : > { %1561 = vpow2.f32 %v900_v44  ;;  %v2979_v40 = vsub.f32 %v1906_v33, %v2073_v61 }
 0x1a0   : > { %v971_v10 = vadd.f32 %v2239_v42, %v970_v63  ;;  %v842_v63 = vmul.f32 1.442695, %v2971_v15  ;;  %v2266_v7 = vpop.eup %1551  ;;  %1563 = vpow2.f32 %v904_v59  ;;  %v912_v17 = vmul.f32 1.442695, %v2974_v62 }
 0x1a1   : > { %1565 = vpow2.f32 %v838_v11  ;;  %v2977_v59 = vsub.f32 %v1999_v48, %v2071_v26  ;;  %v854_v11 = vmul.f32 1.442695, %v2979_v40  ;;  %v2981_v48 = vsub.f32 %v1912_v37, %v2073_v61 }
 0x1a2   : > { %v972_v30 = vadd.f32 %v2248_v51, %v971_v10  ;;  %v846_v10 = vmul.f32 1.442695, %v2973_v20  ;;  %1567 = vpow2.f32 %v842_v63  ;;  %v2980_v63 = vsub.f32 %v2005_v56, %v2071_v26 }
 0x1a3   : > { %1569 = vpow2.f32 %v908_v3  ;;  %v916_v25 = vmul.f32 1.442695, %v2977_v59  ;;  %v858_v20 = vmul.f32 1.442695, %v2981_v48  ;;  %v2983_v56 = vsub.f32 %v1918_v41, %v2073_v61 }
 0x1a4   : > { %v973_v24 = vadd.f32 %v2257_v43, %v972_v30  ;;  %v2275_v44 = vpop.eup %1553  ;;  %v850_v30 = vmul.f32 1.442695, %v2976_v32  ;;  %1571 = vpow2.f32 %v846_v10  ;;  %v920_v29 = vmul.f32 1.442695, %v2980_v63 }
 0x1a5   : > { %2975 = vst [vmem:[#allocation9_spill] sm:$0xff] %v2275_v44  ;;  %v2284_v28 = vpop.eup %1555  ;;  %1573 = vpow2.f32 %v912_v17  ;;  %v2982_v10 = vsub.f32 %v2011_v0, %v2071_v26  ;;  %v2984_v37 = vsub.f32 %v2017_v8, %v2071_v26  ;;  %v2986_v41 = vsub.f32 %v2023_v16, %v2071_v26 }
 0x1a6   : > { %v974_v22 = vadd.f32 %v2266_v7, %v973_v24  ;;  %2978 = vst [vmem:[#allocation10_spill] sm:$0xff] %v2284_v28  ;;  %v2293_v24 = vpop.eup %1557  ;;  %1575 = vpow2.f32 %v850_v30 }
 0x1a7   : > { %1577 = vpow2.f32 %v916_v25  ;;  %v924_v33 = vmul.f32 1.442695, %v2982_v10  ;;  %v928_v30 = vmul.f32 1.442695, %v2984_v37  ;;  %v2985_v25 = vsub.f32 %v1924_v45, %v2073_v61 }
 0x1a8   : > { %v975_v15 = vadd.f32 %v2275_v44, %v974_v22  ;;  %v2302_v17 = vpop.eup %1559  ;;  %1579 = vpow2.f32 %v854_v11  ;;  %v862_v22 = vmul.f32 1.442695, %v2983_v56  ;;  %v932_v11 = vmul.f32 1.442695, %v2986_v41 }
 0x1a9   : > { %v2307_v32 = vpop.eup %1561  ;;  %1581 = vpow2.f32 %v920_v29  ;;  %v2987_v29 = vsub.f32 %v1930_v49, %v2073_v61  ;;  %v2988_v45 = vsub.f32 %v2029_v34, %v2071_v26  ;;  %v2992_v41 = vsub.f32 %v2041_v2, %v2071_v26 }
 0x1aa   : > { %v976_v3 = vadd.f32 %v2284_v28, %v975_v15  ;;  %v2313_v0 = vpop.eup %1563  ;;  %1583 = vpow2.f32 %v858_v20  ;;  %v866_v15 = vmul.f32 1.442695, %v2985_v25  ;;  %v2991_v25 = vsub.f32 %v1942_v57, %v2073_v61 }
 0x1ab   : > { %v2318_v40 = vpop.eup %1565  ;;  %1585 = vpow2.f32 %v924_v33  ;;  %v936_v20 = vmul.f32 1.442695, %v2988_v45 }
 0x1ac   : > { %v977_v62 = vadd.f32 %v2293_v24, %v976_v3  ;;  %v2324_v8 = vpop.eup %1567  ;;  %1587 = vpow2.f32 %v862_v22  ;;  %v870_v3 = vmul.f32 1.442695, %v2987_v29  ;;  %v2990_v22 = vsub.f32 %v2035_v50, %v2071_v26 }
 0x1ad   : > { %v2329_v48 = vpop.eup %1569  ;;  %1589 = vpow2.f32 %v928_v30  ;;  %v1001_v16 = vadd.f32 %v2324_v8, %v2318_v40 }
 0x1ae   : > { %v978_v59 = vadd.f32 %v2302_v17, %v977_v62  ;;  %v2337_v33 = vpop.eup %1571  ;;  %1591 = vpow2.f32 %v866_v15  ;;  %v2989_v62 = vsub.f32 %v1936_v53, %v2073_v61  ;;  %v940_v34 = vmul.f32 1.442695, %v2990_v22 }
 0x1af   : > { %v2342_v56 = vpop.eup %1573  ;;  %1593 = vpow2.f32 %v932_v11  ;;  %v1002_v30 = vadd.f32 %v2337_v33, %v1001_v16  ;;  %v878_v15 = vmul.f32 1.442695, %v2991_v25  ;;  %v944_v11 = vmul.f32 1.442695, %v2992_v41 }
 0x1b0   : > { %v979_v63 = vadd.f32 %v2307_v32, %v978_v59  ;;  %v874_v49 = vmul.f32 1.442695, %v2989_v62  ;;  %v2349_v59 = vpop.eup %1575  ;;  %1595 = vpow2.f32 %v870_v3  ;;  %v2993_v3 = vsub.f32 %v2941_v21, %v2073_v61 }
 0x1b1   : > { %v2354_v53 = vpop.eup %1577  ;;  %1597 = vpow2.f32 %v936_v20  ;;  %v2994_v20 = vsub.f32 %v2047_v12, %v2071_v26 }
 0x1b2   : > { %v980_v10 = vadd.f32 %v2313_v0, %v979_v63  ;;  %v1003_v63 = vadd.f32 %v2349_v59, %v1002_v30  ;;  %v2361_v29 = vpop.eup %1579  ;;  %1599 = vpow2.f32 %v874_v49  ;;  %v882_v45 = vmul.f32 1.442695, %v2993_v3 }
 0x1b3   : > { %v2366_v57 = vpop.eup %1581  ;;  %1601 = vpow2.f32 %v940_v34  ;;  %v2995_v49 = vsub.f32 %v2942_v5, %v2073_v61  ;;  %v2996_v34 = vsub.f32 %v2053_v4, %v2071_v26 }
 0x1b4   : > { %v981_v37 = vadd.f32 %v2329_v48, %v980_v10  ;;  %v948_v10 = vmul.f32 1.442695, %v2994_v20  ;;  %v1004_v16 = vadd.f32 %v2361_v29, %v1003_v63  ;;  %v2373_v62 = vpop.eup %1583  ;;  %1603 = vpow2.f32 %v878_v15 }
 0x1b5   : > { %v886_v22 = vmul.f32 1.442695, %v2995_v49  ;;  %v2378_v21 = vpop.eup %1585  ;;  %1605 = vpow2.f32 %v944_v11  ;;  %v2997_v15 = vsub.f32 %v2943_v19, %v2073_v61  ;;  %v2998_v11 = vsub.f32 %v2059_v60, %v2071_v26 }
 0x1b6   : > { %v982_v50 = vadd.f32 %v2342_v56, %v981_v37  ;;  %v952_v37 = vmul.f32 1.442695, %v2996_v34  ;;  %v1005_v30 = vadd.f32 %v2373_v62, %v1004_v16  ;;  %v2385_v25 = vpop.eup %1587  ;;  %1607 = vpow2.f32 %v882_v45 }
 0x1b7   : > { %v890_v41 = vmul.f32 1.442695, %v2997_v15  ;;  %v2390_v5 = vpop.eup %1589  ;;  %1609 = vpow2.f32 %v948_v10  ;;  %v2999_v45 = vsub.f32 %v2945_v58, %v2073_v61  ;;  %v3000_v10 = vsub.f32 %v2065_v52, %v2071_v26 }
 0x1b8   : > { %v983_v2 = vadd.f32 %v2354_v53, %v982_v50  ;;  %v956_v50 = vmul.f32 1.442695, %v2998_v11  ;;  %v1006_v63 = vadd.f32 %v2385_v25, %v1005_v30  ;;  %v2397_v3 = vpop.eup %1591  ;;  %1611 = vpow2.f32 %v886_v22 }
 0x1b9   : > { %v894_v20 = vmul.f32 1.442695, %v2999_v45  ;;  %v2402_v19 = vpop.eup %1593  ;;  %1613 = vpow2.f32 %v952_v37  ;;  %v3001_v22 = vsub.f32 %v2946_v46, %v2073_v61  ;;  %v3002_v26 = vsub.f32 %v2947_v23, %v2073_v61 }
 0x1ba   : > { %v984_v12 = vadd.f32 %v2366_v57, %v983_v2  ;;  %v960_v2 = vmul.f32 1.442695, %v3000_v10  ;;  %v1007_v16 = vadd.f32 %v2397_v3, %v1006_v63  ;;  %v2409_v49 = vpop.eup %1595  ;;  %1615 = vpow2.f32 %v890_v41 }
 0x1bb   : > { %v898_v34 = vmul.f32 1.442695, %v3001_v22  ;;  %v2414_v58 = vpop.eup %1597  ;;  %1617 = vpow2.f32 %v956_v50  ;;  %v902_v30 = vmul.f32 1.442695, %v3002_v26  ;;  %v3003_v50 = vsub.f32 %v2948_v1, %v2073_v61 }
 0x1bc   : > { %v985_v4 = vadd.f32 %v2378_v21, %v984_v12  ;;  %v1008_v12 = vadd.f32 %v2409_v49, %v1007_v16  ;;  %v2418_v52 = vpop.eup %1599  ;;  %1619 = vpow2.f32 %v894_v20  ;;  %v3004_v10 = vsub.f32 %v2949_v36, %v2073_v61 }
 0x1bd   : > { %v2423_v15 = vpop.eup %1601  ;;  %1621 = vpow2.f32 %v960_v2 }
 0x1be   : > { %v986_v60 = vadd.f32 %v2390_v5, %v985_v4  ;;  %v1009_v41 = vadd.f32 %v2418_v52, %v1008_v12  ;;  %v2427_v11 = vpop.eup %1603  ;;  %1623 = vpow2.f32 %v898_v34  ;;  %v906_v4 = vmul.f32 1.442695, %v3003_v50 }
 0x1bf   : > { %v2432_v63 = vpop.eup %1605  ;;  %1625 = vpow2.f32 %v902_v30  ;;  %v910_v2 = vmul.f32 1.442695, %v3004_v10  ;;  %v3006_v34 = vsub.f32 %v2951_v9, %v2073_v61  ;;  %v1525_v10 = vld [vmem:[%s2463_s4 + $0x4] ss:$8 sps:$4 sm:$0xff]  }
 0x1c0   : > { %v987_v37 = vadd.f32 %v2402_v19, %v986_v60  ;;  %v1010_v45 = vadd.f32 %v2427_v11, %v1009_v41  ;;  %v2436_v20 = vpop.eup %1607  ;;  %1627 = vpow2.f32 %v906_v4  ;;  %1192 = vmatprep.mubr.bf16.mxu1 %v1525_v10 }
 0x1c1   : > { %v2441_v60 = vpop.eup %1609  ;;  %1629 = vpow2.f32 %v910_v2 }
 0x1c2   : > { %v988_v46 = vadd.f32 %v2414_v58, %v987_v37  ;;  %v1011_v1 = vadd.f32 %v2436_v20, %v1010_v45  ;;  %v2445_v22 = vpop.eup %1611  ;;  %v914_v37 = vmul.f32 1.442695, %v3006_v34  ;;  %v3009_v45 = vsub.f32 %v2953_v6, %v2073_v61 }
 0x1c3   : > { %3005 = vst [vmem:[#allocation11_spill] sm:$0xff] %v2445_v22  ;;  %v2450_v12 = vpop.eup %1613 }
 0x1c4   : > { %v989_v23 = vadd.f32 %v2423_v15, %v988_v46  ;;  %v1012_v36 = vadd.f32 %v2445_v22, %v1011_v1  ;;  %v2455_v30 = vpop.eup %1615  ;;  %v3008_v46 = vsub.f32 %v2952_v38, %v2073_v61  ;;  %1631 = vpow2.f32 %v914_v37 }
 0x1c5   : > { %3007 = vst [vmem:[#allocation12_spill] sm:$0xff] %v2455_v30  ;;  %v2465_v9 = vpop.eup %1617  ;;  %v922_v38 = vmul.f32 1.442695, %v3009_v45  ;;  %v3011_v45 = vld [vmem:[#allocation18_spill] sm:$0xff] }
 0x1c6   : > { %v990_v16 = vadd.f32 %v2432_v63, %v989_v23  ;;  %v918_v41 = vmul.f32 1.442695, %v3008_v46  ;;  %v1013_v4 = vadd.f32 %v2455_v30, %v1012_v36  ;;  %v2469_v23 = vpop.eup %1619 }
 0x1c7   : > { %v2475_v2 = vpop.eup %1621 }
 0x1c8   : > { %v991_v26 = vadd.f32 %v2441_v60, %v990_v16  ;;  %v1014_v1 = vadd.f32 %v2469_v23, %v1013_v4  ;;  %v2479_v34 = vpop.eup %1623  ;;  %1633 = vpow2.f32 %v918_v41 }
 0x1c9   : > { %v2486_v46 = vpop.eup %1625  ;;  %1635 = vpow2.f32 %v922_v38  ;;  %v3014_v38 = vsub.f32 %v2958_v27, %v2073_v61  ;;  %v3017_v27 = vsub.f32 %v2961_v39, %v2073_v61 }
 0x1ca   : > { %v992_v50 = vadd.f32 %v2450_v12, %v991_v26  ;;  %v3010_v26 = vsub.f32 %v2954_v55, %v2073_v61  ;;  %v1015_v6 = vadd.f32 %v2479_v34, %v1014_v1  ;;  %v2492_v41 = vpop.eup %1627  ;;  %v3013_v55 = vsub.f32 %v2957_v47, %v2073_v61 }
 0x1cc   : > { %v993_v16 = vadd.f32 %v2465_v9, %v992_v50  ;;  %v926_v36 = vmul.f32 1.442695, %v3010_v26  ;;  %v3012_v50 = vsub.f32 %v3011_v45, %v2073_v61  ;;  %v1016_v44 = vadd.f32 %v2486_v46, %v1015_v6  ;;  %v2498_v26 = vpop.eup %1629 }
 0x1cd   : > { %v934_v10 = vmul.f32 1.442695, %v3013_v55  ;;  %v938_v45 = vmul.f32 1.442695, %v3014_v38 }
 0x1ce   : > { %v994_v37 = vadd.f32 %v2475_v2, %v993_v16  ;;  %v930_v28 = vmul.f32 1.442695, %v3012_v50  ;;  %1637 = vpow2.f32 %v926_v36  ;;  %v1017_v1 = vadd.f32 %v2492_v41, %v1016_v44  ;;  %v2504_v30 = vpop.eup %1631  ;;  %v3015_v36 = vld [vmem:[#allocation21_spill] sm:$0xff] }
 0x1cf   : > { %v3016_v47 = vsub.f32 %v3015_v36, %v2073_v61 }
 0x1d0   : > { %v995_v4 = vrot.slane %v994_v37, 4  ;;  %1639 = vpow2.f32 %v930_v28  ;;  %v1018_v6 = vadd.f32 %v2498_v26, %v1017_v1  ;;  %v946_v28 = vmul.f32 1.442695, %v3017_v27 }
 0x1d1   : > { %1641 = vpow2.f32 %v934_v10  ;;  %v942_v55 = vmul.f32 1.442695, %v3016_v47  ;;  %v3018_v10 = vsub.f32 %v2962_v18, %v2073_v61 }
 0x1d2   : > { %v996_v16 = vadd.f32 %v995_v4, %v994_v37  ;;  %v1019_v44 = vadd.f32 %v2504_v30, %v1018_v6  ;;  %v2510_v4 = vpop.eup %1633  ;;  %1643 = vpow2.f32 %v938_v45 }
 0x1d3   : > { %v2516_v22 = vpop.eup %1635  ;;  %1645 = vpow2.f32 %v942_v55  ;;  %v950_v36 = vmul.f32 1.442695, %v3018_v10  ;;  %v3020_v55 = vsub.f32 %v2964_v31, %v2073_v61 }
 0x1d4   : > { %v997_v50 = vrot.slane %v996_v16, 2  ;;  %v1020_v1 = vadd.f32 %v2510_v4, %v1019_v44  ;;  %1647 = vpow2.f32 %v946_v28 }
 0x1d5   : > { %1649 = vpow2.f32 %v950_v36  ;;  %v958_v18 = vmul.f32 1.442695, %v3020_v55 }
 0x1d6   : > { %v998_v37 = vadd.f32 %v997_v50, %v996_v16  ;;  %v3019_v16 = vsub.f32 %v2963_v54, %v2073_v61  ;;  %v1021_v45 = vadd.f32 %v2516_v22, %v1020_v1  ;;  %v3021_v1 = vld [vmem:[#allocation26_spill] sm:$0xff] }
 0x1d7   : > { %v3022_v10 = vsub.f32 %v3021_v1, %v2073_v61 }
 0x1d8   : > { %v999_v38 = vrot.slane %v998_v37, 1  ;;  %v954_v50 = vmul.f32 1.442695, %v3019_v16  ;;  %v2525_v6 = vpop.eup %1637 }
 0x1d9   : > { %v1022_v47 = vadd.f32 %v2525_v6, %v1021_v45 }
 0x1da   : > { %v1000_v39 = vadd.f32 %v999_v38, %v998_v37  ;;  %v2528_v44 = vpop.eup %1639  ;;  %1651 = vpow2.f32 %v954_v50  ;;  %v962_v37 = vmul.f32 1.442695, %v3022_v10 }
 0x1db   : > { %v1023_v27 = vadd.f32 %v2528_v44, %v1022_v47  ;;  %v2534_v54 = vpop.eup %1641 }
 0x1dc   : > { %1653 = vrcp.f32 %v1000_v39  ;;  %v2540_v38 = vpop.eup %1643 }
 0x1dd   : > { %v1024_v28 = vadd.f32 %v2534_v54, %v1023_v27  ;;  %1655 = vpow2.f32 %v958_v18  ;;  %v2543_v16 = vpop.eup %1645 }
 0x1de   : > { %1657 = vpow2.f32 %v962_v37  ;;  %v2546_v50 = vpop.eup %1647 }
 0x1df   : > { %v1025_v36 = vadd.f32 %v2540_v38, %v1024_v28  ;;  %v2549_v39 = vpop.eup %1649 }
 0x1e1   : > { %v1026_v31 = vadd.f32 %v2543_v16, %v1025_v36 }
 0x1e3   : > { %v1027_v45 = vadd.f32 %v2546_v50, %v1026_v31 }
 0x1e4   : > { %v2551_v61 = vpop.eup %1651 }
 0x1e5   : > { %v1028_v47 = vadd.f32 %v2549_v39, %v1027_v45 }
 0x1e6   : > { %v2554_v55 = vpop.eup %1653 }
 0x1e7   : > { %v1029_v18 = vadd.f32 %v2551_v61, %v1028_v47  ;;  %v2557_v27 = vpop.eup %1655  ;;  %v2562_v10 = vmul.f32 %v2554_v55, %v2293_v24  ;;  %v2566_v37 = vmul.f32 %v2554_v55, %v2302_v17  ;;  %v2572_v36 = vmul.f32 %v2554_v55, %v2307_v32 }
 0x1e8   : > { %v2568_v28 = vpop.eup %1657  ;;  %v2576_v31 = vmul.f32 %v2554_v55, %v2313_v0  ;;  %v2583_v47 = vmul.f32 %v2554_v55, %v2329_v48  ;;  %v2587_v17 = vmul.f32 %v2554_v55, %v2342_v56  ;;  %v2593_v0 = vmul.f32 %v2554_v55, %v2354_v53 }
 0x1e9   : > { %v1030_v1 = vadd.f32 %v2557_v27, %v1029_v18  ;;  %v2597_v18 = vmul.f32 %v2554_v55, %v2366_v57  ;;  %v2607_v24 = vmul.f32 %v2554_v55, %v2390_v5  ;;  %v2611_v53 = vmul.f32 %v2554_v55, %v2402_v19 }
 0x1ea   : > { %3023 = vst [vmem:[#allocation13_spill] sm:$0xff] %v2583_v47  ;;  %v2617_v32 = vmul.f32 %v2554_v55, %v2414_v58  ;;  %v2625_v56 = vmul.f32 %v2554_v55, %v2432_v63  ;;  %v2631_v47 = vmul.f32 %v2554_v55, %v2441_v60  ;;  %v2635_v58 = vmul.f32 %v2554_v55, %v2450_v12 }
 0x1eb   : > { %v1031_v45 = vadd.f32 %v2568_v28, %v1030_v1  ;;  %v2601_v1 = vmul.f32 %v2554_v55, %v2378_v21  ;;  %3025 = vst [vmem:[#allocation15_spill] sm:$0xff] %v2607_v24  ;;  %3026 = vst [vmem:[#allocation16_spill] sm:$0xff] %v2611_v53  ;;  %v2621_v21 = vmul.f32 %v2554_v55, %v2423_v15  ;;  %v3033_v24 = vld [vmem:[#allocation7_spill] sm:$0xff] }
 0x1ec   : > { %3027 = vst [vmem:[#allocation17_spill] sm:$0xff] %v2617_v32  ;;  %3029 = vst [vmem:[#allocation20_spill] sm:$0xff] %v2625_v56  ;;  %v2643_v63 = vmul.f32 %v2554_v55, %v2465_v9  ;;  %v3031_v56 = vld [vmem:[#allocation28_spill] sm:$0xff]  ;;  %v3032_v32 = vld [vmem:[#allocation6_spill] sm:$0xff] }
 0x1ed   : > { %3024 = vst [vmem:[#allocation14_spill] sm:$0xff] %v2601_v1  ;;  %v1032_v48 = vrot.slane %v1031_v45, 4  ;;  %3028 = vst [vmem:[#allocation19_spill] sm:$0xff] %v2621_v21  ;;  %v3030_v21 = vld [vmem:[#allocation27_spill] sm:$0xff]  ;;  %v1044_v1 = vmul.f32 %v2554_v55, %v3032_v32 }
 0x1ee   : > { %v1040_v9 = vmul.f32 %v2554_v55, %v3030_v21 }
 0x1ef   : > { %v1033_v5 = vadd.f32 %v1032_v48, %v1031_v45  ;;  %v2647_v45 = vmul.f32 %v2554_v55, %v2475_v2  ;;  %v1042_v2 = vmul.f32 %v2554_v55, %v3031_v56  ;;  %v1046_v48 = vmul.f32 %v2554_v55, %v3033_v24 }
 0x1f1   : > { %v1034_v60 = vrot.slane %v1033_v5, 2  ;;  %v1104_v24 = vpack.c.bf16 %v1042_v2, %v1040_v9 }
 0x1f3   : > { %v1035_v19 = vadd.f32 %v1034_v60, %v1033_v5  ;;  %v3034_v60 = vld [vmem:[#allocation8_spill] sm:$0xff] }
 0x1f5   : > { %v1036_v15 = vrot.slane %v1035_v19, 1 }
 0x1f7   : > { %v1037_v53 = vadd.f32 %v1036_v15, %v1035_v19 }
 0x1f9   : > { %1659 = vrcp.f32 %v1037_v53 }
 0x203   : > { %v2653_v57 = vpop.eup %1659 }
 0x204   : > { %v1041_v5 = vmul.f32 %v2653_v57, %v2318_v40  ;;  %v1043_v53 = vmul.f32 %v2653_v57, %v2324_v8  ;;  %v1045_v19 = vmul.f32 %v2653_v57, %v2337_v33  ;;  %v1047_v21 = vmul.f32 %v2653_v57, %v2349_v59 }
 0x205   : > { %v1049_v56 = vmul.f32 %v2653_v57, %v2361_v29  ;;  %v1051_v32 = vmul.f32 %v2653_v57, %v2373_v62  ;;  %v1048_v40 = vmul.f32 %v2554_v55, %v3034_v60  ;;  %v1050_v8 = vmul.f32 %v2554_v55, %v2218_v13 }
 0x206   : > { %v1105_v15 = vpack.c.bf16 %v1043_v53, %v1041_v5  ;;  %v1052_v33 = vmul.f32 %v2554_v55, %v2227_v14  ;;  %v1107_v12 = vpack.c.bf16 %v1047_v21, %v1045_v19  ;;  %v1106_v59 = vpack.c.bf16 %v1046_v48, %v1044_v1 }
 0x207   : > { %v1053_v5 = vmul.f32 %v2653_v57, %v2385_v25  ;;  %v2685_v29 = vmul.f32 %v2653_v57, %v2469_v23  ;;  %v1055_v62 = vmul.f32 %v2653_v57, %v2397_v3  ;;  %v1071_v13 = vmul.f32 %v2653_v57, %v2479_v34 }
 0x208   : > { %1160 = vmatprep.subr.bf16.mxu1 %v1105_v15  ;;  %v1073_v14 = vmul.f32 %v2653_v57, %v2486_v46  ;;  %v1075_v1 = vmul.f32 %v2653_v57, %v2492_v41  ;;  %v1109_v48 = vpack.c.bf16 %v1051_v32, %v1049_v56  ;;  %v1077_v25 = vmul.f32 %v2653_v57, %v2498_v26 }
 0x209   : > { %1161 = vmatpush1.bf16.msra.mxu1 %v1104_v24  ;;  %v1079_v23 = vmul.f32 %v2653_v57, %v2504_v30  ;;  %v1081_v3 = vmul.f32 %v2653_v57, %v2510_v4  ;;  %v1119_v9 = vpack.c.bf16 %v1071_v13, %v2685_v29  ;;  %v1083_v46 = vmul.f32 %v2653_v57, %v2516_v22  ;;  %v3038_v13 = vld [vmem:[#allocation10_spill] sm:$0xff] }
 0x20a   : > { %1162 = vmatprep.subr.bf16.mxu1 %v1107_v12  ;;  %v1121_v34 = vpack.c.bf16 %v1075_v1, %v1073_v14  ;;  %v1085_v41 = vmul.f32 %v2653_v57, %v2525_v6  ;;  %v1087_v2 = vmul.f32 %v2653_v57, %v2528_v44  ;;  %v1089_v26 = vmul.f32 %v2653_v57, %v2534_v54 }
 0x20b   : > { %v1123_v12 = vpack.c.bf16 %v1079_v23, %v1077_v25  ;;  %v1091_v30 = vmul.f32 %v2653_v57, %v2540_v38  ;;  %v1125_v4 = vpack.c.bf16 %v1083_v46, %v1081_v3  ;;  %v1093_v53 = vmul.f32 %v2653_v57, %v2543_v16 }
 0x20c   : > { %v1095_v22 = vmul.f32 %v2653_v57, %v2546_v50  ;;  %v1097_v6 = vmul.f32 %v2653_v57, %v2549_v39  ;;  %v1127_v19 = vpack.c.bf16 %v1087_v2, %v1085_v41  ;;  %v1099_v54 = vmul.f32 %v2653_v57, %v2551_v61  ;;  %v1526_v41 = vld [vmem:[%s2463_s4 + $0x14] ss:$8 sps:$4 sm:$0xff]  }
 0x20d   : > { %1163 = vmatpush1.bf16.msra.mxu1 %v1106_v59  ;;  %v1129_v44 = vpack.c.bf16 %v1091_v30, %v1089_v26  ;;  %v1101_v38 = vmul.f32 %v2653_v57, %v2557_v27  ;;  %v1108_v21 = vpack.c.bf16 %v1050_v8, %v1048_v40  ;;  %v1054_v15 = vmul.f32 %v2554_v55, %v2233_v35  ;;  %v3035_v59 = vld [vmem:[#allocation11_spill] sm:$0xff] }
 0x20e   : > { %1164 = vmatprep.subr.bf16.mxu1 %v1109_v48  ;;  %v1131_v16 = vpack.c.bf16 %v1095_v22, %v1093_v53  ;;  %v1103_v50 = vmul.f32 %v2653_v57, %v2568_v28  ;;  %v1111_v56 = vpack.c.bf16 %v1055_v62, %v1053_v5  ;;  %v1057_v39 = vmul.f32 %v2653_v57, %v2409_v49  ;;  %v3036_v5 = vld [vmem:[#allocation12_spill] sm:$0xff]  ;;  %v1224_v26 = vld [vmem:[%s2785_s11 + $0x8] sm:$0xff] }
 0x20f   : > { %v1059_v32 = vmul.f32 %v2653_v57, %v2418_v52  ;;  %v1133_v24 = vpack.c.bf16 %v1099_v54, %v1097_v6  ;;  %v1110_v27 = vpack.c.bf16 %v1054_v15, %v1052_v33  ;;  %v1056_v60 = vmul.f32 %v2554_v55, %v2239_v42  ;;  %v1225_v53 = vld [vmem:[%s2785_s11 + $0x10] sm:$0xff] }
 0x210   : > { %v1135_v61 = vpack.c.bf16 %v1103_v50, %v1101_v38  ;;  %v1058_v35 = vmul.f32 %v2554_v55, %v2248_v51  ;;  %v1061_v28 = vmul.f32 %v2653_v57, %v2427_v11  ;;  %v1063_v49 = vmul.f32 %v2653_v57, %v2436_v20  ;;  %v3037_v20 = vld [vmem:[#allocation9_spill] sm:$0xff]  ;;  %v1227_v50 = vld [vmem:[%s2785_s11 + $0x20] sm:$0xff] }
 0x211   : > { %1165 = vmatpush1.bf16.msra.mxu1 %v1108_v21  ;;  %v1113_v40 = vpack.c.bf16 %v1059_v32, %v1057_v39  ;;  %v1060_v8 = vmul.f32 %v2554_v55, %v2257_v43  ;;  %v1062_v33 = vmul.f32 %v2554_v55, %v2266_v7  ;;  %v1065_v51 = vmul.f32 %v2653_v57, %v3035_v59  ;;  %v1228_v32 = vld [vmem:[%s2785_s11 + $0x28] sm:$0xff] }
 0x212   : > { %1166 = vmatprep.subr.bf16.mxu1 %v1111_v56  ;;  %v1112_v52 = vpack.c.bf16 %v1058_v35, %v1056_v60  ;;  %v1115_v42 = vpack.c.bf16 %v1063_v49, %v1061_v28  ;;  %v1067_v29 = vmul.f32 %v2653_v57, %v3036_v5  ;;  %v1064_v62 = vmul.f32 %v2554_v55, %v3037_v20  ;;  %v1230_v28 = vld [vmem:[%s2785_s11 + $0x38] sm:$0xff] }
 0x213   : > { %v1114_v11 = vpack.c.bf16 %v1062_v33, %v1060_v8  ;;  %v1066_v14 = vmul.f32 %v2554_v55, %v3038_v13  ;;  %v3039_v1 = vpack.c.bf16 %v2566_v37, %v2562_v10  ;;  %v3040_v57 = vpack.c.bf16 %v2576_v31, %v2572_v36  ;;  %v3041_v55 = vld [vmem:[#allocation13_spill] sm:$0xff]  ;;  %v3044_v10 = vld [vmem:[#allocation15_spill] sm:$0xff]  ;;  %v3045_v37 = vld [vmem:[#allocation14_spill] sm:$0xff] }
 0x214   : > { %v1117_v43 = vpack.c.bf16 %v1067_v29, %v1065_v51  ;;  %v3042_v48 = vpack.c.bf16 %v2587_v17, %v3041_v55  ;;  %v3043_v25 = vpack.c.bf16 %v2597_v18, %v2593_v0  ;;  %v3046_v23 = vpack.c.bf16 %v3044_v10, %v3045_v37  ;;  %v3047_v36 = vld [vmem:[#allocation17_spill] sm:$0xff]  ;;  %v3048_v31 = vld [vmem:[#allocation16_spill] sm:$0xff]  ;;  %v1523_v18 = vld [vmem:[%s2463_s4] ss:$8 sps:$4 sm:$0xff]  }
 0x215   : > { %1167 = vmatpush1.bf16.msra.mxu1 %v1110_v27  ;;  %v1116_v7 = vpack.c.bf16 %v1066_v14, %v1064_v62  ;;  %v3049_v3 = vpack.c.bf16 %v3047_v36, %v3048_v31  ;;  %v3050_v17 = vld [vmem:[#allocation20_spill] sm:$0xff]  ;;  %v3053_v0 = vpack.c.bf16 %v2635_v58, %v2631_v47  ;;  %v3054_v46 = vpack.c.bf16 %v2647_v45, %v2643_v63  ;;  %v1223_v63 = vld [vmem:[%s2785_s11] sm:$0xff] }
 0x216   : > { %1168 = vmatprep.subr.bf16.mxu1 %v1113_v40  ;;  %v1214_v47 = vstv %s1213_s26  ;;  %v1229_v27 = vld [vmem:[%s2785_s11 + $0x30] sm:$0xff] }
 0x219   : > { %1169 = vmatpush1.bf16.msra.mxu1 %v1112_v52 }
 0x21a   : > { %1170 = vmatprep.subr.bf16.mxu1 %v1115_v42 }
 0x21d   : > { %1171 = vmatpush1.bf16.msra.mxu1 %v1114_v11 }
 0x21e   : > { %1172 = vmatprep.subr.bf16.mxu1 %v1117_v43 }
 0x221   : > { %1173 = vmatpush1.bf16.msra.mxu1 %v1116_v7 }
 0x222   : > { %1174 = vmatprep.subr.bf16.mxu1 %v1119_v9  ;;  %v3051_v9 = vld [vmem:[#allocation19_spill] sm:$0xff] }
 0x225   : > { %1175 = vmatpush1.bf16.msra.mxu1 %v3039_v1 }
 0x226   : > { %1176 = vmatprep.subr.bf16.mxu1 %v1121_v34  ;;  %v3052_v34 = vpack.c.bf16 %v3050_v17, %v3051_v9 }
 0x229   : > { %1177 = vmatpush1.bf16.msra.mxu1 %v3040_v57 }
 0x22a   : > { %1178 = vmatprep.subr.bf16.mxu1 %v1123_v12  ;;  %v1528_v12 = vld [vmem:[%s2463_s4 + $0x10] ss:$8 sps:$4 sm:$0xff]   ;;  %s1665_s4 = sshll.u32 %s1742_s19, 4  ;;  %s1666_s4 = int_to_ptr.vmem [resolvable:$false] %s1665_s4 }
 0x22b   : > { %s1667_s26 = scalar_lea.vmem %s1666_s4, 2048  ;;  %p1668_p1 = scmp.lt.s32.totalorder %s2803_s14, %s1666_s4 }
 0x22c   : > { %p1669_p2 = scmp.lt.s32.totalorder %s1667_s26, %s1661_s18 }
 0x22d   : > { %1179 = vmatpush1.bf16.msra.mxu1 %v3042_v48 }
 0x22e   : > { %1180 = vmatprep.subr.bf16.mxu1 %v1125_v4  ;;  %p1670_p3 = por %p1669_p2, %p1668_p1 }
 0x230   : > { %p1671_p5 = pnand %p1670_p3, %p1664_p0 }
 0x231   : > { %1181 = vmatpush1.bf16.msra.mxu1 %v3043_v25 }
 0x232   : > { %1182 = vmatprep.subr.bf16.mxu1 %v1127_v19 }
 0x235   : > { %1183 = vmatpush1.bf16.msra.mxu1 %v3046_v23 }
 0x236   : > { %1184 = vmatprep.subr.bf16.mxu1 %v1129_v44  ;;  %v1226_v44 = vld [vmem:[%s2785_s11 + $0x18] sm:$0xff] }
 0x239   : > { %1185 = vmatpush1.bf16.msra.mxu1 %v3049_v3 }
 0x23a   : > { %1186 = vmatprep.subr.bf16.mxu1 %v1131_v16 }
 0x23d   : > { %1187 = vmatpush1.bf16.msra.mxu1 %v3052_v34 }
 0x23e   : > { %1188 = vmatprep.subr.bf16.mxu1 %v1133_v24 }
 0x241   : > { %1189 = vmatpush1.bf16.msra.mxu1 %v3053_v0 }
 0x242   : > { %1190 = vmatprep.subr.bf16.mxu1 %v1135_v61 }
 0x245   : > { %1191 = vmatpush1.bf16.msra.mxu1 %v3054_v46 }
 0x248   : > { %1193 = vmatmul.mubr.bf16.vlgmr.msra.gmra.mrb[0].mxu1 %v1523_v18 }
 0x249   : > { %1202 = vmatprep.mubr.bf16.mxu1 %v1526_v41 }
 0x250   : > { %1203 = vmatmul.mubr.bf16.gmra.mrb[4].mxu1 %v1528_v12 }
 0x31b   : > { %v1194_v58 = vpop.f32.mrb[0].mxu1 }
 0x31c   : > { %v1215_v45 = vmul.f32 %v1214_v47, %v1194_v58  ;;  %v1196_v2 = vpop.f32.mrb[1].mxu1 }
 0x31d   : > { %v1216_v30 = vmul.f32 %v1214_v47, %v1196_v2  ;;  %v1198_v4 = vpop.f32.mrb[2].mxu1 }
 0x31e   : > { %v1231_v22 = vadd.f32 %v1223_v63, %v1215_v45  ;;  %v1217_v6 = vmul.f32 %v1214_v47, %v1198_v4  ;;  %v1200_v19 = vpop.f32.mrb[3].mxu1 }
 0x31f   : > { %v1232_v54 = vadd.f32 %v1224_v26, %v1216_v30  ;;  %v1218_v38 = vmul.f32 %v1214_v47, %v1200_v19 }
 0x320   : > { %1239 = vst [vmem:[%s299_s8] sm:$0xff] %v1231_v22  ;;  %v1233_v21 = vadd.f32 %v1225_v53, %v1217_v6 }
 0x321   : > { %1240 = vst [vmem:[%s299_s8 + $0x8] sm:$0xff] %v1232_v54  ;;  %v1234_v15 = vadd.f32 %v1226_v44, %v1218_v38 }
 0x322   : > { %1241 = vst [vmem:[%s299_s8 + $0x10] sm:$0xff] %v1233_v21 }
 0x323   : > { %1242 = vst [vmem:[%s299_s8 + $0x18] sm:$0xff] %v1234_v15  ;;  %v1204_v16 = vpop.f32.mrb[4].mxu1 }
 0x324   : > { %v1219_v56 = vmul.f32 %v1214_v47, %v1204_v16  ;;  %v1206_v39 = vpop.f32.mrb[5].mxu1 }
 0x325   : > { %v1220_v24 = vmul.f32 %v1214_v47, %v1206_v39  ;;  %v1208_v61 = vpop.f32.mrb[6].mxu1 }
 0x326   : > { %v1235_v60 = vadd.f32 %v1227_v50, %v1219_v56  ;;  %v1221_v35 = vmul.f32 %v1214_v47, %v1208_v61  ;;  %v1210_v40 = vpop.f32.mrb[7].mxu1 }
 0x327   : > { %v1236_v49 = vadd.f32 %v1228_v32, %v1220_v24  ;;  %v1222_v52 = vmul.f32 %v1214_v47, %v1210_v40 }
 0x328   : > { %1243 = vst [vmem:[%s299_s8 + $0x20] sm:$0xff] %v1235_v60  ;;  %v1237_v8 = vadd.f32 %v1229_v27, %v1221_v35 }
 0x329   : > { %1244 = vst [vmem:[%s299_s8 + $0x28] sm:$0xff] %v1236_v49  ;;  %v1238_v33 = vadd.f32 %v1230_v28, %v1222_v52 }
 0x32a   : > { %1245 = vst [vmem:[%s299_s8 + $0x30] sm:$0xff] %v1237_v8 }
 0x32b   : > { %1246 = vst [vmem:[%s299_s8 + $0x38] sm:$0xff] %v1238_v33 }
 0x32c   : > { %1674 = shalt.err (!%p1671_p5)
}
 0x32d   : > { %s1675_s28 = scalar_lea.hbm %s2801_s17, 1024  ;;  %s1679_s10 = scalar_lea.hbm %s2858_s5, 2048 }
 0x32e   : > { %p1676_p6 = scmp.ne.s32.totalorder %s2801_s17, %s1675_s28  ;;  %p1680_p10 = scmp.lt.u32.totalorder %s2801_s17, %s2858_s5 }
 0x32f   : > { %p1681_p11 = scmp.lt.u32.totalorder %s1679_s10, %s1675_s28  ;;  %p1683_p13 = scmp.lt.u32.totalorder %s1675_s28, %s2801_s17 }
 0x330   : > { %p1677_p7 = pnand %p1676_p6, %p1818_p4 }
 0x331   : > { %p1682_p12 = por %p1681_p11, %p1680_p10 }
 0x332   : > { %p1678_p9 = pneg %p1677_p7 }
 0x333   : > { %p1684_p0 = por %p1683_p13, %p1682_p12 }
 0x335   : > { %p1685_p1 = pnand %p1684_p0, %p1678_p9 }
 0x337   : > { %1688 = shalt.err (!%p1685_p1)
}
 0x338   : > { %s1743_s8 = smov 256   ;;  %s1744_s13 = smov 16  }
 0x339   : > { %1446 = dma.vmem_to_hbm [thread:$0]  (%p1818_p4), %s2803_s14, 1024, %s2801_s17, %s2807_s23, %s1743_s8, %s1743_s8, %s1744_s13  }
 0x33a PF: > { %p1452_p2 = scmp.ge.s32.totalorder %s1739_s25, 2  ;;  %s1278_s15 = sand.u32 1, %s1719_s20  }
 0x33b   : > { %s1279_s16 = scalar_lea.sflag [#allocation4], %s1278_s15 }
 0x33c   : > { %p1449_p3 = pnand %p1452_p2, %p1825_p8 }
 0x33e   : > { %1714 = dma.done.wait (!%p1449_p3), %s1279_s16, 1024  }
 0x33f   : > { %1716 = vsyncadd (!%p1449_p3), %s1279_s16, 4294966272  ;;  %s19_s25 = sadd.s32 1, %s1739_s25   ;;  %s3055_s20 = smov %s1723_s21 }
 0x340   : > { %p16_p5 = scmp.ge.s32.totalorder %s19_s25, 4   ;;  %s3056_s21 = smov %s1727_s22 }
 0x341   : > { %s3057_s22 = smov %s1831_s7  ;;  %s3058_s23 = smov %s1735_s24 }
 0x342   : > { %s3059_s24 = smov %s3061_s27  ;;  %18 = sbr.rel (!%p16_p5) target bundleno = 6 (0x6), region = 84 }
 0x349   :  { %1284 = vsyncpa [#allocation4], 1 }
 0x34a   :  { %1286 = vsyncpa [#allocation4 + $0x1], 1 }

</bundles_post_ra>
